<compile_context>
chip_gen: v7x
topology: tpu7x:2x2x1
jax: 0.10.0
libtpu: 0.0.40
codegen_flags: <defaults>
</compile_context>

<pallas_src>
import math

import jax
import jax.numpy as jnp
from jax.experimental import pallas as pl
from jax.experimental.pallas import tpu as pltpu

# --- small synthetic config (mirrors GPT(d_model, nhead, num_layers, dim_feedforward, vocab_size)) ---
D_MODEL = 32
N_HEAD = 4
NUM_LAYERS = 2
D_FF = 64
VOCAB = 64
VOCAB_PAD = 128     # lane-dense LM head; padded columns sliced off after the kernel
EPS = 1e-5          # nn.LayerNorm default eps
NEG = -1e30         # additive mask value standing in for -inf (keep mask in f32)

# TODO(synk): at real model size pick D_MODEL / D_FF / VOCAB as 128/256 multiples
# (or pad them) so every MXU pass is lane-dense, tile the per-layer weight matmuls
# over N/K (pl.Buffered(2-3) on the stacked weight BlockSpecs), add flash-style KV
# tiling over sequence, and re-derive tile sizes / vmem_limit_bytes for v7x's
# 64 MiB VMEM budget.


# ----------------------------------------------------------------------------
# Pallas kernels
# ----------------------------------------------------------------------------
def make_layers_kernel(S, D, H, Dh):
    """All NUM_LAYERS pre-norm TransformerEncoderLayers (eval mode), fused.

    grid = (B, NUM_LAYERS); batch axis "parallel", layer axis "arbitrary".
    The (S, D) residual stream lives in the output block (constant block index
    across the layer axis => resident in VMEM, written back to HBM only when the
    batch block changes).
    """
    scale = 1.0 / math.sqrt(Dh)

    def kernel(x_ref, padneg_ref,
               wq_ref, wk_ref, wv_ref, bq_ref, bk_ref, bv_ref,
               wo_ref, bo_ref,
               g1_ref, be1_ref, g2_ref, be2_ref,
               w1_ref, b1_ref, w2_ref, b2_ref,
               out_ref, mask_ref):
        l = pl.program_id(1)

        @pl.when(l == 0)
        def _init():
            # residual stream accumulator (out_ref is revisited across layers)
            out_ref[...] = x_ref[...]
            # layer-invariant causal + key-padding additive mask, built once
            ridx = jax.lax.broadcasted_iota(jnp.int32, (S, S), 0)
            cidx = jax.lax.broadcasted_iota(jnp.int32, (S, S), 1)
            mask_ref[...] = jnp.where(cidx <= ridx, 0.0, NEG) + padneg_ref[0]

        x = out_ref[...]                      # (S, D) f32 residual stream
        mask = mask_ref[...]                  # (S, S) f32

        # ---- self-attention block: x = x + Wo * MHA(LN1(x)) ----
        mu = jnp.mean(x, axis=-1, keepdims=True)
        var = jnp.mean((x - mu) ** 2, axis=-1, keepdims=True)
        xn = (x - mu) * jax.lax.rsqrt(var + EPS) * g1_ref[0] + be1_ref[0]

        # head-batched projections: heads on the leading (batch) axis; bf16 MXU
        # operands, f32 accumulation; no per-head lane slices / concat.
        xn_h = jnp.broadcast_to(xn.astype(jnp.bfloat16), (H, S, D))
        proj = (((2,), (1,)), ((0,), (0,)))   # batched (contract last-of-lhs with dim1-of-rhs)
        q = jax.lax.dot_general(xn_h, wq_ref[0], proj,
                                preferred_element_type=jnp.float32) + bq_ref[0]   # (H,S,Dh)
        k = jax.lax.dot_general(xn_h, wk_ref[0], proj,
                                preferred_element_type=jnp.float32) + bk_ref[0]
        v = jax.lax.dot_general(xn_h, wv_ref[0], proj,
                                preferred_element_type=jnp.float32) + bv_ref[0]

        qk = (((2,), (2,)), ((0,), (0,)))     # 'hqd,hkd->hqk'
        s = jax.lax.dot_general(q.astype(jnp.bfloat16), k.astype(jnp.bfloat16), qk,
                                preferred_element_type=jnp.float32) * scale + mask[None]
        s = s - jnp.max(s, axis=-1, keepdims=True)
        p = jnp.exp(s)
        p = p * pl.reciprocal(jnp.sum(p, axis=-1, keepdims=True), approx=True)

        o = jax.lax.dot_general(p.astype(jnp.bfloat16), v.astype(jnp.bfloat16), proj,
                                preferred_element_type=jnp.float32)               # (H,S,Dh)
        # per-head output projection + reduce over heads (== concat @ Wo)
        attn = jax.lax.dot_general(o.astype(jnp.bfloat16), wo_ref[0], proj,
                                   preferred_element_type=jnp.float32)            # (H,S,D)
        x = x + jnp.sum(attn, axis=0) + bo_ref[0]

        # ---- feed-forward block: x = x + W2 relu(W1 LN2(x) + b1) + b2 ----
        mu2 = jnp.mean(x, axis=-1, keepdims=True)
        var2 = jnp.mean((x - mu2) ** 2, axis=-1, keepdims=True)
        xn2 = (x - mu2) * jax.lax.rsqrt(var2 + EPS) * g2_ref[0] + be2_ref[0]
        h1 = jnp.maximum(
            jnp.dot(xn2.astype(jnp.bfloat16), w1_ref[0],
                    preferred_element_type=jnp.float32) + b1_ref[0], 0.0)
        x = x + jnp.dot(h1.astype(jnp.bfloat16), w2_ref[0],
                        preferred_element_type=jnp.float32) + b2_ref[0]

        out_ref[...] = x

    return kernel


def lm_head_kernel(x_ref, w_ref, b_ref, o_ref, acc_ref):
    """Tiled LM head: (M, D) @ (D, Vpad) + b, bf16 operands, f32 accumulator."""
    k = pl.program_id(2)

    @pl.when(k == 0)
    def _():
        acc_ref[...] = jnp.zeros_like(acc_ref)

    acc_ref[...] += jnp.dot(x_ref[...], w_ref[...], preferred_element_type=jnp.float32)

    @pl.when(k == pl.num_programs(2) - 1)
    def _():
        o_ref[...] = acc_ref[...] + b_ref[...]


# ----------------------------------------------------------------------------
# Wrappers around pallas_call
# ----------------------------------------------------------------------------
def gpt_layers(x2d, padneg, kp, *, B, S):
    M, D = x2d.shape
    L, H = kp['wq'].shape[0], kp['wq'].shape[1]
    Dh = kp['wq'].shape[3]

    def act_spec():                       # per-batch (S, D) row block of the (B*S, D) slab
        return pl.BlockSpec((S, D), lambda b, l: (b, 0))

    def per_layer(arr):                   # (L, ...) stacked per-layer parameter
        nd = arr.ndim
        return pl.BlockSpec((1,) + tuple(arr.shape[1:]),
                            lambda b, l, _nd=nd: (l,) + (0,) * (_nd - 1))

    kernel = make_layers_kernel(S, D, H, Dh)
    return pl.pallas_call(
        kernel,
        out_shape=jax.ShapeDtypeStruct((M, D), jnp.float32),
        grid=(B, L),
        in_specs=[
            act_spec(),
            pl.BlockSpec((1, 1, S), lambda b, l: (b, 0, 0)),
            per_layer(kp['wq']), per_layer(kp['wk']), per_layer(kp['wv']),
            per_layer(kp['bq']), per_layer(kp['bk']), per_layer(kp['bv']),
            per_layer(kp['wo']), per_layer(kp['bo']),
            per_layer(kp['g1']), per_layer(kp['be1']),
            per_layer(kp['g2']), per_layer(kp['be2']),
            per_layer(kp['w1']), per_layer(kp['b1']),
            per_layer(kp['w2']), per_layer(kp['b2']),
        ],
        out_specs=act_spec(),
        scratch_shapes=[pltpu.VMEM((S, S), jnp.float32)],   # hoisted additive mask
        compiler_params=pltpu.CompilerParams(
            dimension_semantics=("parallel", "arbitrary"),
            vmem_limit_bytes=32 * 1024 * 1024),
    )(x2d, padneg,
      kp['wq'], kp['wk'], kp['wv'], kp['bq'], kp['bk'], kp['bv'],
      kp['wo'], kp['bo'], kp['g1'], kp['be1'], kp['g2'], kp['be2'],
      kp['w1'], kp['b1'], kp['w2'], kp['b2'])


def lm_head(x2d_bf16, w_t, b):
    M, D = x2d_bf16.shape
    Vp = w_t.shape[1]
    tm = min(256, M)
    tn = min(256, Vp)        # Vp is a 128 multiple -> lane-dense output stores
    tk = min(256, D)
    grid = (pl.cdiv(M, tm), pl.cdiv(Vp, tn), pl.cdiv(D, tk))
    return pl.pallas_call(
        lm_head_kernel,
        out_shape=jax.ShapeDtypeStruct((M, Vp), jnp.float32),
        grid=grid,
        in_specs=[
            pl.BlockSpec((tm, tk), lambda i, j, k: (i, k)),
            pl.BlockSpec((tk, tn), lambda i, j, k: (k, j)),
            pl.BlockSpec((1, tn), lambda i, j, k: (0, j)),
        ],
        out_specs=pl.BlockSpec((tm, tn), lambda i, j, k: (i, j)),
        scratch_shapes=[pltpu.VMEM((tm, tn), jnp.float32)],
        compiler_params=pltpu.CompilerParams(
            dimension_semantics=("parallel", "parallel", "arbitrary"),
            vmem_limit_bytes=32 * 1024 * 1024),
    )(x2d_bf16, w_t, b)


# ----------------------------------------------------------------------------
# Glue: embedding lookup, sinusoidal PE, padding vector (plain JAX)
# ----------------------------------------------------------------------------
def sinusoid_pe(S, D):
    even_i = jnp.arange(0, D, 2, dtype=jnp.float32)
    denom = jnp.power(10000.0, even_i / D)
    pos = jnp.arange(S, dtype=jnp.float32)[:, None]
    even_pe = jnp.sin(pos / denom)
    odd_pe = jnp.cos(pos / denom)
    return jnp.stack([even_pe, odd_pe], axis=2).reshape(S, D)


def gpt_forward(tokens, embedding, kp):
    B, S = tokens.shape
    M = B * S

    # token embedding (padding_idx=0 row is zero) + sinusoidal positional encoding
    # (gather stays in plain JAX -- no clean Pallas gather at this scale)
    x = embedding[tokens] + sinusoid_pe(S, D_MODEL)[None]
    x2d = x.reshape(M, D_MODEL).astype(jnp.float32)

    # key-padding additive vector, O(B*S); the (S,S) mask is built in-kernel once
    padneg = jnp.where(tokens == 0, NEG, 0.0).astype(jnp.float32).reshape(B, 1, S)

    h = gpt_layers(x2d, padneg, kp, B=B, S=S)
    logits_pad = lm_head(h.astype(jnp.bfloat16), kp['wout_pad'], kp['bout_pad'])
    return logits_pad[:, :VOCAB].reshape(B, S, VOCAB)


# ----------------------------------------------------------------------------
# Parameter init (PyTorch-like layout) + kernel-layout preparation
# ----------------------------------------------------------------------------
def init_params(key):
    keys = jax.random.split(key, 2 + NUM_LAYERS)
    emb = 0.02 * jax.random.normal(keys[0], (VOCAB, D_MODEL), jnp.float32)
    emb = emb.at[0].set(0.0)  # padding_idx = 0

    def bf16_round(w):  # kernel consumes bf16 weights; master copy equals them exactly
        return w.astype(jnp.bfloat16).astype(jnp.float32)

    layers = []
    for l in range(NUM_LAYERS):
        k = jax.random.split(keys[1 + l], 8)
        layers.append(dict(
            wqkv=bf16_round(0.05 * jax.random.normal(k[0], (D_MODEL, 3 * D_MODEL), jnp.float32)),
            bqkv=0.01 * jax.random.normal(k[1], (1, 3 * D_MODEL), jnp.float32),
            wo=bf16_round(0.05 * jax.random.normal(k[2], (D_MODEL, D_MODEL), jnp.float32)),
            bo=0.01 * jax.random.normal(k[3], (1, D_MODEL), jnp.float32),
            g1=jnp.ones((1, D_MODEL), jnp.float32),
            be1=jnp.zeros((1, D_MODEL), jnp.float32),
            g2=jnp.ones((1, D_MODEL), jnp.float32),
            be2=jnp.zeros((1, D_MODEL), jnp.float32),
            w1=bf16_round(0.05 * jax.random.normal(k[4], (D_MODEL, D_FF), jnp.float32)),
            b1=0.01 * jax.random.normal(k[5], (1, D_FF), jnp.float32),
            w2=bf16_round(0.05 * jax.random.normal(k[6], (D_FF, D_MODEL), jnp.float32)),
            b2=0.01 * jax.random.normal(k[7], (1, D_MODEL), jnp.float32),
        ))
    wout = bf16_round(0.05 * jax.random.normal(keys[-1], (D_MODEL, VOCAB), jnp.float32))
    bout = jnp.zeros((1, VOCAB), jnp.float32)
    return dict(embedding=emb, layers=layers, wout=wout, bout=bout)


def prepare_kernel_params(params):
    """Split QKV / out-proj weights per head, stack per layer, cast weights to bf16."""
    D, H, Dh = D_MODEL, N_HEAD, D_MODEL // N_HEAD
    names = ['wq', 'wk', 'wv', 'bq', 'bk', 'bv', 'wo', 'bo',
             'g1', 'be1', 'g2', 'be2', 'w1', 'b1', 'w2', 'b2']
    st = {n: [] for n in names}

    def head_w(w):   # (D, D) -> (H, D, Dh)
        return jnp.transpose(w.reshape(D, H, Dh), (1, 0, 2))

    def head_b(b):   # (D,)  -> (H, 1, Dh)
        return b.reshape(H, Dh)[:, None, :]

    for lp in params['layers']:
        wqkv, bqkv = lp['wqkv'], lp['bqkv']
        st['wq'].append(head_w(wqkv[:, 0:D]))
        st['wk'].append(head_w(wqkv[:, D:2 * D]))
        st['wv'].append(head_w(wqkv[:, 2 * D:3 * D]))
        st['bq'].append(head_b(bqkv[0, 0:D]))
        st['bk'].append(head_b(bqkv[0, D:2 * D]))
        st['bv'].append(head_b(bqkv[0, 2 * D:3 * D]))
        st['wo'].append(lp['wo'].reshape(H, Dh, D))
        st['bo'].append(lp['bo'])
        st['g1'].append(lp['g1']); st['be1'].append(lp['be1'])
        st['g2'].append(lp['g2']); st['be2'].append(lp['be2'])
        st['w1'].append(lp['w1']); st['b1'].append(lp['b1'])
        st['w2'].append(lp['w2']); st['b2'].append(lp['b2'])

    bf16_names = {'wq', 'wk', 'wv', 'wo', 'w1', 'w2'}
    kp = {}
    for n in names:
        a = jnp.stack(st[n], axis=0)
        kp[n] = a.astype(jnp.bfloat16) if n in bf16_names else a

    # lane-dense LM head: pad vocab to 128 lanes (extra columns are zero, sliced off)
    wout_pad = jnp.zeros((D, VOCAB_PAD), jnp.float32).at[:, :VOCAB].set(params['wout'])
    bout_pad = jnp.zeros((1, VOCAB_PAD), jnp.float32).at[:, :VOCAB].set(params['bout'])
    kp['wout_pad'] = wout_pad.astype(jnp.bfloat16)
    kp['bout_pad'] = bout_pad
    return kp


# ----------------------------------------------------------------------------
# Pure-JAX reference (same math, f32) for a correctness check
# ----------------------------------------------------------------------------
def ref_forward(tokens, params):
    B, S = tokens.shape
    H, Dh = N_HEAD, D_MODEL // N_HEAD
    causal = jnp.triu(jnp.ones((S, S), dtype=bool), k=1)
    pad = tokens == 0
    addmask = jnp.where(causal[None] | pad[:, None, :], NEG, 0.0).astype(jnp.float32)
    x = params['embedding'][tokens] + sinusoid_pe(S, D_MODEL)[None]
    for lp in params['layers']:
        mu = x.mean(-1, keepdims=True)
        var = ((x - mu) ** 2).mean(-1, keepdims=True)
        xn = (x - mu) / jnp.sqrt(var + EPS) * lp['g1'][0] + lp['be1'][0]
        qkv = xn @ lp['wqkv'] + lp['bqkv'][0]
        q, k, v = jnp.split(qkv, 3, axis=-1)
        q = q.reshape(B, S, H, Dh).transpose(0, 2, 1, 3)
        k = k.reshape(B, S, H, Dh).transpose(0, 2, 1, 3)
        v = v.reshape(B, S, H, Dh).transpose(0, 2, 1, 3)
        s = jnp.einsum('bhqd,bhkd->bhqk', q, k) / math.sqrt(Dh) + addmask[:, None]
        w = jax.nn.softmax(s, axis=-1)
        o = jnp.einsum('bhqk,bhkd->bhqd', w, v).transpose(0, 2, 1, 3).reshape(B, S, D_MODEL)
        x = x + o @ lp['wo'] + lp['bo'][0]
        mu2 = x.mean(-1, keepdims=True)
        var2 = ((x - mu2) ** 2).mean(-1, keepdims=True)
        xn2 = (x - mu2) / jnp.sqrt(var2 + EPS) * lp['g2'][0] + lp['be2'][0]
        x = x + jnp.maximum(xn2 @ lp['w1'] + lp['b1'][0], 0.0) @ lp['w2'] + lp['b2'][0]
    return x @ params['wout'] + params['bout'][0]


if __name__ == "__main__":
    key = jax.random.PRNGKey(0)
    pkey, tkey = jax.random.split(key)
    params = init_params(pkey)
    kp = prepare_kernel_params(params)

    B, S = 2, 8
    # token ids in [1, VOCAB) so no padding rows (PyTorch would NaN on fully-masked rows)
    tokens = jax.random.randint(tkey, (B, S), 1, VOCAB, dtype=jnp.int32)

    logits = jax.block_until_ready(gpt_forward(tokens, params['embedding'], kp))
    assert logits.shape == (B, S, VOCAB)
    assert bool(jnp.all(jnp.isfinite(logits)))

    ref = ref_forward(tokens, params)
    err = float(jnp.max(jnp.abs(logits - ref)))
    # bf16 MXU operands + approx reciprocal in-kernel vs. f32 reference
    assert err < 2e-2, err

    print("KERNEL_OK")
</pallas_src>

<mosaic_0001>
module attributes {stable_mosaic.version = 11 : i64} {
  func.func @kernel(%arg0: i32, %arg1: i32, %arg2: memref<8x32xf32, #tpu.memory_space<vmem>>, %arg3: memref<1x1x8xf32, #tpu.memory_space<vmem>>, %arg4: memref<1x4x32x8xbf16, #tpu.memory_space<vmem>>, %arg5: memref<1x4x32x8xbf16, #tpu.memory_space<vmem>>, %arg6: memref<1x4x32x8xbf16, #tpu.memory_space<vmem>>, %arg7: memref<1x4x1x8xf32, #tpu.memory_space<vmem>>, %arg8: memref<1x4x1x8xf32, #tpu.memory_space<vmem>>, %arg9: memref<1x4x1x8xf32, #tpu.memory_space<vmem>>, %arg10: memref<1x4x8x32xbf16, #tpu.memory_space<vmem>>, %arg11: memref<1x1x32xf32, #tpu.memory_space<vmem>>, %arg12: memref<1x1x32xf32, #tpu.memory_space<vmem>>, %arg13: memref<1x1x32xf32, #tpu.memory_space<vmem>>, %arg14: memref<1x1x32xf32, #tpu.memory_space<vmem>>, %arg15: memref<1x1x32xf32, #tpu.memory_space<vmem>>, %arg16: memref<1x32x64xbf16, #tpu.memory_space<vmem>>, %arg17: memref<1x1x64xf32, #tpu.memory_space<vmem>>, %arg18: memref<1x64x32xbf16, #tpu.memory_space<vmem>>, %arg19: memref<1x1x32xf32, #tpu.memory_space<vmem>>, %arg20: memref<8x32xf32, #tpu.memory_space<vmem>>, %arg21: memref<8x8xf32, #tpu.memory_space<vmem>>) attributes {dimension_semantics = [#tpu.dimension_semantics<parallel>, #tpu.dimension_semantics<arbitrary>], iteration_bounds = array<i64: 2, 2>, scalar_prefetch = 0 : i64, scratch_operands = 1 : i64, tpu.core_type = #tpu.core_type<tc>, window_params = [{transform_indices = @transform_0, window_bounds = array<i64: 8, 32>}, {transform_indices = @transform_1, window_bounds = array<i64: 1, 1, 8>}, {transform_indices = @transform_2, window_bounds = array<i64: 1, 4, 32, 8>}, {transform_indices = @transform_3, window_bounds = array<i64: 1, 4, 32, 8>}, {transform_indices = @transform_4, window_bounds = array<i64: 1, 4, 32, 8>}, {transform_indices = @transform_5, window_bounds = array<i64: 1, 4, 1, 8>}, {transform_indices = @transform_6, window_bounds = array<i64: 1, 4, 1, 8>}, {transform_indices = @transform_7, window_bounds = array<i64: 1, 4, 1, 8>}, {transform_indices = @transform_8, window_bounds = array<i64: 1, 4, 8, 32>}, {transform_indices = @transform_9, window_bounds = array<i64: 1, 1, 32>}, {transform_indices = @transform_10, window_bounds = array<i64: 1, 1, 32>}, {transform_indices = @transform_11, window_bounds = array<i64: 1, 1, 32>}, {transform_indices = @transform_12, window_bounds = array<i64: 1, 1, 32>}, {transform_indices = @transform_13, window_bounds = array<i64: 1, 1, 32>}, {transform_indices = @transform_14, window_bounds = array<i64: 1, 32, 64>}, {transform_indices = @transform_15, window_bounds = array<i64: 1, 1, 64>}, {transform_indices = @transform_16, window_bounds = array<i64: 1, 64, 32>}, {transform_indices = @transform_17, window_bounds = array<i64: 1, 1, 32>}, {transform_indices = @transform_18, window_bounds = array<i64: 8, 32>}]} {
    %c0_i32 = arith.constant 0 : i32
    %0 = arith.cmpi eq, %arg1, %c0_i32 : i32
    %1 = arith.extui %0 : i1 to i32
    %c0_i32_0 = arith.constant 0 : i32
    %2 = arith.cmpi ne, %1, %c0_i32_0 : i32
    scf.if %2 {
      %c0_83 = arith.constant 0 : index
      %c0_84 = arith.constant 0 : index
      %132 = vector.load %arg2[%c0_83, %c0_84] : memref<8x32xf32, #tpu.memory_space<vmem>>, vector<8x32xf32>
      %c0_85 = arith.constant 0 : index
      %c0_86 = arith.constant 0 : index
      %133 = vector.load %arg20[%c0_85, %c0_86] : memref<8x32xf32, #tpu.memory_space<vmem>>, vector<8x32xf32>
      tpu.vector_store %arg20[%c0_85, %c0_86], %132 {strides = array<i32>} : memref<8x32xf32, #tpu.memory_space<vmem>>, vector<8x32xf32>,
      %134 = tpu.iota {dimensions = array<i32: 0>} : vector<8x8xi32>
      %135 = tpu.iota {dimensions = array<i32: 1>} : vector<8x8xi32>
      %136 = arith.cmpi sle, %135, %134 : vector<8x8xi32>
      %cst_87 = arith.constant 0.000000e+00 : f32
      %cst_88 = arith.constant -1.000000e+30 : f32
      %137 = vector.broadcast %cst_87 : f32 to vector<8x8xf32>
      %138 = vector.broadcast %cst_88 : f32 to vector<8x8xf32>
      %139 = arith.select %136, %137, %138 : vector<8x8xi1>, vector<8x8xf32>
      %c0_89 = arith.constant 0 : index
      %c0_90 = arith.constant 0 : index
      %c0_91 = arith.constant 0 : index
      %140 = vector.load %arg3[%c0_89, %c0_90, %c0_91] : memref<1x1x8xf32, #tpu.memory_space<vmem>>, vector<1x1x8xf32>
      %141 = vector.shape_cast %140 : vector<1x1x8xf32> to vector<1x8xf32>
      %142 = vector.broadcast %141 : vector<1x8xf32> to vector<8x8xf32>
      %143 = arith.addf %139, %142 : vector<8x8xf32>
      %c0_92 = arith.constant 0 : index
      %c0_93 = arith.constant 0 : index
      %144 = vector.load %arg21[%c0_92, %c0_93] : memref<8x8xf32, #tpu.memory_space<vmem>>, vector<8x8xf32>
      tpu.vector_store %arg21[%c0_92, %c0_93], %143 {strides = array<i32>} : memref<8x8xf32, #tpu.memory_space<vmem>>, vector<8x8xf32>,
    } else {
    }
    %c0 = arith.constant 0 : index
    %c0_1 = arith.constant 0 : index
    %3 = vector.load %arg20[%c0, %c0_1] : memref<8x32xf32, #tpu.memory_space<vmem>>, vector<8x32xf32>
    %c0_2 = arith.constant 0 : index
    %c0_3 = arith.constant 0 : index
    %4 = vector.load %arg21[%c0_2, %c0_3] : memref<8x8xf32, #tpu.memory_space<vmem>>, vector<8x8xf32>
    %cst = arith.constant dense<0.000000e+00> : vector<8xf32>
    %5 = vector.multi_reduction <add>, %3, %cst [1] : vector<8x32xf32> to vector<8xf32>
    %6 = vector.shape_cast %5 : vector<8xf32> to vector<8x1xf32>
    %cst_4 = arith.constant 3.200000e+01 : f32
    %7 = vector.broadcast %cst_4 : f32 to vector<8x1xf32>
    %8 = arith.divf %6, %7 : vector<8x1xf32>
    %9 = vector.broadcast %8 : vector<8x1xf32> to vector<8x32xf32>
    %10 = arith.subf %3, %9 : vector<8x32xf32>
    %11 = arith.mulf %10, %10 : vector<8x32xf32>
    %cst_5 = arith.constant dense<0.000000e+00> : vector<8xf32>
    %12 = vector.multi_reduction <add>, %11, %cst_5 [1] : vector<8x32xf32> to vector<8xf32>
    %13 = vector.shape_cast %12 : vector<8xf32> to vector<8x1xf32>
    %cst_6 = arith.constant 3.200000e+01 : f32
    %14 = vector.broadcast %cst_6 : f32 to vector<8x1xf32>
    %15 = arith.divf %13, %14 : vector<8x1xf32>
    %16 = vector.broadcast %8 : vector<8x1xf32> to vector<8x32xf32>
    %17 = arith.subf %3, %16 : vector<8x32xf32>
    %cst_7 = arith.constant 9.99999974E-6 : f32
    %18 = vector.broadcast %cst_7 : f32 to vector<8x1xf32>
    %19 = arith.addf %15, %18 : vector<8x1xf32>
    %20 = math.rsqrt %19 : vector<8x1xf32>
    %21 = vector.broadcast %20 : vector<8x1xf32> to vector<8x32xf32>
    %22 = arith.mulf %17, %21 : vector<8x32xf32>
    %c0_8 = arith.constant 0 : index
    %c0_9 = arith.constant 0 : index
    %c0_10 = arith.constant 0 : index
    %23 = vector.load %arg12[%c0_8, %c0_9, %c0_10] : memref<1x1x32xf32, #tpu.memory_space<vmem>>, vector<1x1x32xf32>
    %24 = vector.shape_cast %23 : vector<1x1x32xf32> to vector<1x32xf32>
    %25 = vector.broadcast %24 : vector<1x32xf32> to vector<8x32xf32>
    %26 = arith.mulf %22, %25 : vector<8x32xf32>
    %c0_11 = arith.constant 0 : index
    %c0_12 = arith.constant 0 : index
    %c0_13 = arith.constant 0 : index
    %27 = vector.load %arg13[%c0_11, %c0_12, %c0_13] : memref<1x1x32xf32, #tpu.memory_space<vmem>>, vector<1x1x32xf32>
    %28 = vector.shape_cast %27 : vector<1x1x32xf32> to vector<1x32xf32>
    %29 = vector.broadcast %28 : vector<1x32xf32> to vector<8x32xf32>
    %30 = arith.addf %26, %29 : vector<8x32xf32>
    %31 = arith.truncf %30 : vector<8x32xf32> to vector<8x32xbf16>
    %32 = vector.shape_cast %31 : vector<8x32xbf16> to vector<1x8x32xbf16>
    %33 = vector.broadcast %32 : vector<1x8x32xbf16> to vector<4x8x32xbf16>
    %c0_14 = arith.constant 0 : index
    %c0_15 = arith.constant 0 : index
    %c0_16 = arith.constant 0 : index
    %c0_17 = arith.constant 0 : index
    %34 = vector.load %arg4[%c0_14, %c0_15, %c0_16, %c0_17] : memref<1x4x32x8xbf16, #tpu.memory_space<vmem>>, vector<1x4x32x8xbf16>
    %35 = vector.shape_cast %34 : vector<1x4x32x8xbf16> to vector<4x32x8xbf16>
    %cst_18 = arith.constant dense<0.000000e+00> : vector<4x8x8xf32>
    %36 = tpu.matmul %33, %35, %cst_18 {dimension_numbers = #tpu.dot_dimension_numbers<[2], [1], [1], [2], [0, 0, 0, 1, 1, 2], [0], [0]>} : vector<4x8x32xbf16>, vector<4x32x8xbf16>, vector<4x8x8xf32> -> vector<4x8x8xf32>
    %c0_19 = arith.constant 0 : index
    %c0_20 = arith.constant 0 : index
    %c0_21 = arith.constant 0 : index
    %c0_22 = arith.constant 0 : index
    %37 = vector.load %arg7[%c0_19, %c0_20, %c0_21, %c0_22] : memref<1x4x1x8xf32, #tpu.memory_space<vmem>>, vector<1x4x1x8xf32>
    %38 = vector.shape_cast %37 : vector<1x4x1x8xf32> to vector<4x1x8xf32>
    %39 = vector.broadcast %38 : vector<4x1x8xf32> to vector<4x8x8xf32>
    %40 = arith.addf %36, %39 : vector<4x8x8xf32>
    %c0_23 = arith.constant 0 : index
    %c0_24 = arith.constant 0 : index
    %c0_25 = arith.constant 0 : index
    %c0_26 = arith.constant 0 : index
    %41 = vector.load %arg5[%c0_23, %c0_24, %c0_25, %c0_26] : memref<1x4x32x8xbf16, #tpu.memory_space<vmem>>, vector<1x4x32x8xbf16>
    %42 = vector.shape_cast %41 : vector<1x4x32x8xbf16> to vector<4x32x8xbf16>
    %cst_27 = arith.constant dense<0.000000e+00> : vector<4x8x8xf32>
    %43 = tpu.matmul %33, %42, %cst_27 {dimension_numbers = #tpu.dot_dimension_numbers<[2], [1], [1], [2], [0, 0, 0, 1, 1, 2], [0], [0]>} : vector<4x8x32xbf16>, vector<4x32x8xbf16>, vector<4x8x8xf32> -> vector<4x8x8xf32>
    %c0_28 = arith.constant 0 : index
    %c0_29 = arith.constant 0 : index
    %c0_30 = arith.constant 0 : index
    %c0_31 = arith.constant 0 : index
    %44 = vector.load %arg8[%c0_28, %c0_29, %c0_30, %c0_31] : memref<1x4x1x8xf32, #tpu.memory_space<vmem>>, vector<1x4x1x8xf32>
    %45 = vector.shape_cast %44 : vector<1x4x1x8xf32> to vector<4x1x8xf32>
    %46 = vector.broadcast %45 : vector<4x1x8xf32> to vector<4x8x8xf32>
    %47 = arith.addf %43, %46 : vector<4x8x8xf32>
    %c0_32 = arith.constant 0 : index
    %c0_33 = arith.constant 0 : index
    %c0_34 = arith.constant 0 : index
    %c0_35 = arith.constant 0 : index
    %48 = vector.load %arg6[%c0_32, %c0_33, %c0_34, %c0_35] : memref<1x4x32x8xbf16, #tpu.memory_space<vmem>>, vector<1x4x32x8xbf16>
    %49 = vector.shape_cast %48 : vector<1x4x32x8xbf16> to vector<4x32x8xbf16>
    %cst_36 = arith.constant dense<0.000000e+00> : vector<4x8x8xf32>
    %50 = tpu.matmul %33, %49, %cst_36 {dimension_numbers = #tpu.dot_dimension_numbers<[2], [1], [1], [2], [0, 0, 0, 1, 1, 2], [0], [0]>} : vector<4x8x32xbf16>, vector<4x32x8xbf16>, vector<4x8x8xf32> -> vector<4x8x8xf32>
    %c0_37 = arith.constant 0 : index
    %c0_38 = arith.constant 0 : index
    %c0_39 = arith.constant 0 : index
    %c0_40 = arith.constant 0 : index
    %51 = vector.load %arg9[%c0_37, %c0_38, %c0_39, %c0_40] : memref<1x4x1x8xf32, #tpu.memory_space<vmem>>, vector<1x4x1x8xf32>
    %52 = vector.shape_cast %51 : vector<1x4x1x8xf32> to vector<4x1x8xf32>
    %53 = vector.broadcast %52 : vector<4x1x8xf32> to vector<4x8x8xf32>
    %54 = arith.addf %50, %53 : vector<4x8x8xf32>
    %55 = arith.truncf %40 : vector<4x8x8xf32> to vector<4x8x8xbf16>
    %56 = arith.truncf %47 : vector<4x8x8xf32> to vector<4x8x8xbf16>
    %cst_41 = arith.constant dense<0.000000e+00> : vector<4x8x8xf32>
    %57 = tpu.matmul %55, %56, %cst_41 {dimension_numbers = #tpu.dot_dimension_numbers<[2], [2], [1], [1], [0, 0, 0, 1, 1, 1], [0], [0]>} : vector<4x8x8xbf16>, vector<4x8x8xbf16>, vector<4x8x8xf32> -> vector<4x8x8xf32>
    %cst_42 = arith.constant 0.353553385 : f32
    %58 = vector.broadcast %cst_42 : f32 to vector<4x8x8xf32>
    %59 = arith.mulf %57, %58 : vector<4x8x8xf32>
    %60 = vector.shape_cast %4 : vector<8x8xf32> to vector<1x8x8xf32>
    %61 = vector.broadcast %60 : vector<1x8x8xf32> to vector<4x8x8xf32>
    %62 = arith.addf %59, %61 : vector<4x8x8xf32>
    %cst_43 = arith.constant dense<0xFF800000> : vector<4x8xf32>
    %63 = vector.multi_reduction <maximumf>, %62, %cst_43 [2] : vector<4x8x8xf32> to vector<4x8xf32>
    %64 = vector.shape_cast %63 : vector<4x8xf32> to vector<4x8x1xf32>
    %65 = vector.broadcast %64 : vector<4x8x1xf32> to vector<4x8x8xf32>
    %66 = arith.subf %62, %65 : vector<4x8x8xf32>
    %67 = math.exp %66 : vector<4x8x8xf32>
    %cst_44 = arith.constant dense<0.000000e+00> : vector<4x8xf32>
    %68 = vector.multi_reduction <add>, %67, %cst_44 [2] : vector<4x8x8xf32> to vector<4x8xf32>
    %69 = vector.shape_cast %68 : vector<4x8xf32> to vector<4x8x1xf32>
    %70 = tpu.reciprocal %69 {approx = true} : vector<4x8x1xf32> -> vector<4x8x1xf32>
    %71 = vector.broadcast %70 : vector<4x8x1xf32> to vector<4x8x8xf32>
    %72 = arith.mulf %67, %71 : vector<4x8x8xf32>
    %73 = arith.truncf %72 : vector<4x8x8xf32> to vector<4x8x8xbf16>
    %74 = arith.truncf %54 : vector<4x8x8xf32> to vector<4x8x8xbf16>
    %cst_45 = arith.constant dense<0.000000e+00> : vector<4x8x8xf32>
    %75 = tpu.matmul %73, %74, %cst_45 {dimension_numbers = #tpu.dot_dimension_numbers<[2], [1], [1], [2], [0, 0, 0, 1, 1, 2], [0], [0]>} : vector<4x8x8xbf16>, vector<4x8x8xbf16>, vector<4x8x8xf32> -> vector<4x8x8xf32>
    %76 = arith.truncf %75 : vector<4x8x8xf32> to vector<4x8x8xbf16>
    %c0_46 = arith.constant 0 : index
    %c0_47 = arith.constant 0 : index
    %c0_48 = arith.constant 0 : index
    %c0_49 = arith.constant 0 : index
    %77 = vector.load %arg10[%c0_46, %c0_47, %c0_48, %c0_49] : memref<1x4x8x32xbf16, #tpu.memory_space<vmem>>, vector<1x4x8x32xbf16>
    %78 = vector.shape_cast %77 : vector<1x4x8x32xbf16> to vector<4x8x32xbf16>
    %cst_50 = arith.constant dense<0.000000e+00> : vector<4x8x32xf32>
    %79 = tpu.matmul %76, %78, %cst_50 {dimension_numbers = #tpu.dot_dimension_numbers<[2], [1], [1], [2], [0, 0, 0, 1, 1, 2], [0], [0]>} : vector<4x8x8xbf16>, vector<4x8x32xbf16>, vector<4x8x32xf32> -> vector<4x8x32xf32>
    %cst_51 = arith.constant dense<0.000000e+00> : vector<8x32xf32>
    %80 = vector.multi_reduction <add>, %79, %cst_51 [0] : vector<4x8x32xf32> to vector<8x32xf32>
    %81 = arith.addf %3, %80 : vector<8x32xf32>
    %c0_52 = arith.constant 0 : index
    %c0_53 = arith.constant 0 : index
    %c0_54 = arith.constant 0 : index
    %82 = vector.load %arg11[%c0_52, %c0_53, %c0_54] : memref<1x1x32xf32, #tpu.memory_space<vmem>>, vector<1x1x32xf32>
    %83 = vector.shape_cast %82 : vector<1x1x32xf32> to vector<1x32xf32>
    %84 = vector.broadcast %83 : vector<1x32xf32> to vector<8x32xf32>
    %85 = arith.addf %81, %84 : vector<8x32xf32>
    %cst_55 = arith.constant dense<0.000000e+00> : vector<8xf32>
    %86 = vector.multi_reduction <add>, %85, %cst_55 [1] : vector<8x32xf32> to vector<8xf32>
    %87 = vector.shape_cast %86 : vector<8xf32> to vector<8x1xf32>
    %cst_56 = arith.constant 3.200000e+01 : f32
    %88 = vector.broadcast %cst_56 : f32 to vector<8x1xf32>
    %89 = arith.divf %87, %88 : vector<8x1xf32>
    %90 = vector.broadcast %89 : vector<8x1xf32> to vector<8x32xf32>
    %91 = arith.subf %85, %90 : vector<8x32xf32>
    %92 = arith.mulf %91, %91 : vector<8x32xf32>
    %cst_57 = arith.constant dense<0.000000e+00> : vector<8xf32>
    %93 = vector.multi_reduction <add>, %92, %cst_57 [1] : vector<8x32xf32> to vector<8xf32>
    %94 = vector.shape_cast %93 : vector<8xf32> to vector<8x1xf32>
    %cst_58 = arith.constant 3.200000e+01 : f32
    %95 = vector.broadcast %cst_58 : f32 to vector<8x1xf32>
    %96 = arith.divf %94, %95 : vector<8x1xf32>
    %97 = vector.broadcast %89 : vector<8x1xf32> to vector<8x32xf32>
    %98 = arith.subf %85, %97 : vector<8x32xf32>
    %cst_59 = arith.constant 9.99999974E-6 : f32
    %99 = vector.broadcast %cst_59 : f32 to vector<8x1xf32>
    %100 = arith.addf %96, %99 : vector<8x1xf32>
    %101 = math.rsqrt %100 : vector<8x1xf32>
    %102 = vector.broadcast %101 : vector<8x1xf32> to vector<8x32xf32>
    %103 = arith.mulf %98, %102 : vector<8x32xf32>
    %c0_60 = arith.constant 0 : index
    %c0_61 = arith.constant 0 : index
    %c0_62 = arith.constant 0 : index
    %104 = vector.load %arg14[%c0_60, %c0_61, %c0_62] : memref<1x1x32xf32, #tpu.memory_space<vmem>>, vector<1x1x32xf32>
    %105 = vector.shape_cast %104 : vector<1x1x32xf32> to vector<1x32xf32>
    %106 = vector.broadcast %105 : vector<1x32xf32> to vector<8x32xf32>
    %107 = arith.mulf %103, %106 : vector<8x32xf32>
    %c0_63 = arith.constant 0 : index
    %c0_64 = arith.constant 0 : index
    %c0_65 = arith.constant 0 : index
    %108 = vector.load %arg15[%c0_63, %c0_64, %c0_65] : memref<1x1x32xf32, #tpu.memory_space<vmem>>, vector<1x1x32xf32>
    %109 = vector.shape_cast %108 : vector<1x1x32xf32> to vector<1x32xf32>
    %110 = vector.broadcast %109 : vector<1x32xf32> to vector<8x32xf32>
    %111 = arith.addf %107, %110 : vector<8x32xf32>
    %112 = arith.truncf %111 : vector<8x32xf32> to vector<8x32xbf16>
    %c0_66 = arith.constant 0 : index
    %c0_67 = arith.constant 0 : index
    %c0_68 = arith.constant 0 : index
    %113 = vector.load %arg16[%c0_66, %c0_67, %c0_68] : memref<1x32x64xbf16, #tpu.memory_space<vmem>>, vector<1x32x64xbf16>
    %114 = vector.shape_cast %113 : vector<1x32x64xbf16> to vector<32x64xbf16>
    %cst_69 = arith.constant dense<0.000000e+00> : vector<8x64xf32>
    %115 = tpu.matmul %112, %114, %cst_69 {dimension_numbers = #tpu.dot_dimension_numbers<[1], [0], [0], [1], [0, 0, 1, 1], [], []>} : vector<8x32xbf16>, vector<32x64xbf16>, vector<8x64xf32> -> vector<8x64xf32>
    %c0_70 = arith.constant 0 : index
    %c0_71 = arith.constant 0 : index
    %c0_72 = arith.constant 0 : index
    %116 = vector.load %arg17[%c0_70, %c0_71, %c0_72] : memref<1x1x64xf32, #tpu.memory_space<vmem>>, vector<1x1x64xf32>
    %117 = vector.shape_cast %116 : vector<1x1x64xf32> to vector<1x64xf32>
    %118 = vector.broadcast %117 : vector<1x64xf32> to vector<8x64xf32>
    %119 = arith.addf %115, %118 : vector<8x64xf32>
    %cst_73 = arith.constant 0.000000e+00 : f32
    %120 = vector.broadcast %cst_73 : f32 to vector<8x64xf32>
    %121 = arith.maximumf %119, %120 : vector<8x64xf32>
    %122 = arith.truncf %121 : vector<8x64xf32> to vector<8x64xbf16>
    %c0_74 = arith.constant 0 : index
    %c0_75 = arith.constant 0 : index
    %c0_76 = arith.constant 0 : index
    %123 = vector.load %arg18[%c0_74, %c0_75, %c0_76] : memref<1x64x32xbf16, #tpu.memory_space<vmem>>, vector<1x64x32xbf16>
    %124 = vector.shape_cast %123 : vector<1x64x32xbf16> to vector<64x32xbf16>
    %cst_77 = arith.constant dense<0.000000e+00> : vector<8x32xf32>
    %125 = tpu.matmul %122, %124, %cst_77 {dimension_numbers = #tpu.dot_dimension_numbers<[1], [0], [0], [1], [0, 0, 1, 1], [], []>} : vector<8x64xbf16>, vector<64x32xbf16>, vector<8x32xf32> -> vector<8x32xf32>
    %126 = arith.addf %85, %125 : vector<8x32xf32>
    %c0_78 = arith.constant 0 : index
    %c0_79 = arith.constant 0 : index
    %c0_80 = arith.constant 0 : index
    %127 = vector.load %arg19[%c0_78, %c0_79, %c0_80] : memref<1x1x32xf32, #tpu.memory_space<vmem>>, vector<1x1x32xf32>
    %128 = vector.shape_cast %127 : vector<1x1x32xf32> to vector<1x32xf32>
    %129 = vector.broadcast %128 : vector<1x32xf32> to vector<8x32xf32>
    %130 = arith.addf %126, %129 : vector<8x32xf32>
    %c0_81 = arith.constant 0 : index
    %c0_82 = arith.constant 0 : index
    %131 = vector.load %arg20[%c0_81, %c0_82] : memref<8x32xf32, #tpu.memory_space<vmem>>, vector<8x32xf32>
    tpu.vector_store %arg20[%c0_81, %c0_82], %130 {strides = array<i32>} : memref<8x32xf32, #tpu.memory_space<vmem>>, vector<8x32xf32>,
    return
  }
  func.func @transform_0(%arg0: i32, %arg1: i32) -> (i32, i32) {
    %c0_i32 = arith.constant 0 : i32
    %c0_i32_0 = arith.constant 0 : i32
    return %arg0, %c0_i32 : i32, i32
  }
  func.func @transform_1(%arg0: i32, %arg1: i32) -> (i32, i32, i32) {
    %c0_i32 = arith.constant 0 : i32
    %c0_i32_0 = arith.constant 0 : i32
    %c0_i32_1 = arith.constant 0 : i32
    return %arg0, %c0_i32, %c0_i32_0 : i32, i32, i32
  }
  func.func @transform_2(%arg0: i32, %arg1: i32) -> (i32, i32, i32, i32) {
    %c0_i32 = arith.constant 0 : i32
    %c0_i32_0 = arith.constant 0 : i32
    %c0_i32_1 = arith.constant 0 : i32
    %c0_i32_2 = arith.constant 0 : i32
    return %arg1, %c0_i32, %c0_i32_0, %c0_i32_1 : i32, i32, i32, i32
  }
  func.func @transform_3(%arg0: i32, %arg1: i32) -> (i32, i32, i32, i32) {
    %c0_i32 = arith.constant 0 : i32
    %c0_i32_0 = arith.constant 0 : i32
    %c0_i32_1 = arith.constant 0 : i32
    %c0_i32_2 = arith.constant 0 : i32
    return %arg1, %c0_i32, %c0_i32_0, %c0_i32_1 : i32, i32, i32, i32
  }
  func.func @transform_4(%arg0: i32, %arg1: i32) -> (i32, i32, i32, i32) {
    %c0_i32 = arith.constant 0 : i32
    %c0_i32_0 = arith.constant 0 : i32
    %c0_i32_1 = arith.constant 0 : i32
    %c0_i32_2 = arith.constant 0 : i32
    return %arg1, %c0_i32, %c0_i32_0, %c0_i32_1 : i32, i32, i32, i32
  }
  func.func @transform_5(%arg0: i32, %arg1: i32) -> (i32, i32, i32, i32) {
    %c0_i32 = arith.constant 0 : i32
    %c0_i32_0 = arith.constant 0 : i32
    %c0_i32_1 = arith.constant 0 : i32
    %c0_i32_2 = arith.constant 0 : i32
    return %arg1, %c0_i32, %c0_i32_0, %c0_i32_1 : i32, i32, i32, i32
  }
  func.func @transform_6(%arg0: i32, %arg1: i32) -> (i32, i32, i32, i32) {
    %c0_i32 = arith.constant 0 : i32
    %c0_i32_0 = arith.constant 0 : i32
    %c0_i32_1 = arith.constant 0 : i32
    %c0_i32_2 = arith.constant 0 : i32
    return %arg1, %c0_i32, %c0_i32_0, %c0_i32_1 : i32, i32, i32, i32
  }
  func.func @transform_7(%arg0: i32, %arg1: i32) -> (i32, i32, i32, i32) {
    %c0_i32 = arith.constant 0 : i32
    %c0_i32_0 = arith.constant 0 : i32
    %c0_i32_1 = arith.constant 0 : i32
    %c0_i32_2 = arith.constant 0 : i32
    return %arg1, %c0_i32, %c0_i32_0, %c0_i32_1 : i32, i32, i32, i32
  }
  func.func @transform_8(%arg0: i32, %arg1: i32) -> (i32, i32, i32, i32) {
    %c0_i32 = arith.constant 0 : i32
    %c0_i32_0 = arith.constant 0 : i32
    %c0_i32_1 = arith.constant 0 : i32
    %c0_i32_2 = arith.constant 0 : i32
    return %arg1, %c0_i32, %c0_i32_0, %c0_i32_1 : i32, i32, i32, i32
  }
  func.func @transform_9(%arg0: i32, %arg1: i32) -> (i32, i32, i32) {
    %c0_i32 = arith.constant 0 : i32
    %c0_i32_0 = arith.constant 0 : i32
    %c0_i32_1 = arith.constant 0 : i32
    return %arg1, %c0_i32, %c0_i32_0 : i32, i32, i32
  }
  func.func @transform_10(%arg0: i32, %arg1: i32) -> (i32, i32, i32) {
    %c0_i32 = arith.constant 0 : i32
    %c0_i32_0 = arith.constant 0 : i32
    %c0_i32_1 = arith.constant 0 : i32
    return %arg1, %c0_i32, %c0_i32_0 : i32, i32, i32
  }
  func.func @transform_11(%arg0: i32, %arg1: i32) -> (i32, i32, i32) {
    %c0_i32 = arith.constant 0 : i32
    %c0_i32_0 = arith.constant 0 : i32
    %c0_i32_1 = arith.constant 0 : i32
    return %arg1, %c0_i32, %c0_i32_0 : i32, i32, i32
  }
  func.func @transform_12(%arg0: i32, %arg1: i32) -> (i32, i32, i32) {
    %c0_i32 = arith.constant 0 : i32
    %c0_i32_0 = arith.constant 0 : i32
    %c0_i32_1 = arith.constant 0 : i32
    return %arg1, %c0_i32, %c0_i32_0 : i32, i32, i32
  }
  func.func @transform_13(%arg0: i32, %arg1: i32) -> (i32, i32, i32) {
    %c0_i32 = arith.constant 0 : i32
    %c0_i32_0 = arith.constant 0 : i32
    %c0_i32_1 = arith.constant 0 : i32
    return %arg1, %c0_i32, %c0_i32_0 : i32, i32, i32
  }
  func.func @transform_14(%arg0: i32, %arg1: i32) -> (i32, i32, i32) {
    %c0_i32 = arith.constant 0 : i32
    %c0_i32_0 = arith.constant 0 : i32
    %c0_i32_1 = arith.constant 0 : i32
    return %arg1, %c0_i32, %c0_i32_0 : i32, i32, i32
  }
  func.func @transform_15(%arg0: i32, %arg1: i32) -> (i32, i32, i32) {
    %c0_i32 = arith.constant 0 : i32
    %c0_i32_0 = arith.constant 0 : i32
    %c0_i32_1 = arith.constant 0 : i32
    return %arg1, %c0_i32, %c0_i32_0 : i32, i32, i32
  }
  func.func @transform_16(%arg0: i32, %arg1: i32) -> (i32, i32, i32) {
    %c0_i32 = arith.constant 0 : i32
    %c0_i32_0 = arith.constant 0 : i32
    %c0_i32_1 = arith.constant 0 : i32
    return %arg1, %c0_i32, %c0_i32_0 : i32, i32, i32
  }
  func.func @transform_17(%arg0: i32, %arg1: i32) -> (i32, i32, i32) {
    %c0_i32 = arith.constant 0 : i32
    %c0_i32_0 = arith.constant 0 : i32
    %c0_i32_1 = arith.constant 0 : i32
    return %arg1, %c0_i32, %c0_i32_0 : i32, i32, i32
  }
  func.func @transform_18(%arg0: i32, %arg1: i32) -> (i32, i32) {
    %c0_i32 = arith.constant 0 : i32
    %c0_i32_0 = arith.constant 0 : i32
    return %arg0, %c0_i32 : i32, i32
  }
}

</mosaic_0001>

<bundles_post_ra>
// kernel: tpu_custom_call.1
= control target key start
LH: loop header
LB: loop body
LE: loop exit
PB: predicated region body
PF: predicated region fallthrough
CT: control target
= control target key end

     0   :  { %s3951_s0 = inlined_call_operand.vmem [shape: f32[16,32], index: 0, kind: input, shape index: {}]   ;;  %s3952_s1 = inlined_call_operand.vmem [shape: f32[2,1,8], index: 1, kind: input, shape index: {}]   ;;  %s3953_s2 = inlined_call_operand.vmem [shape: bf16[2,4,32,8], index: 2, kind: input, shape index: {}]   ;;  %s3954_s3 = inlined_call_operand.vmem [shape: bf16[2,4,32,8], index: 3, kind: input, shape index: {}]   ;;  %s3955_s4 = inlined_call_operand.vmem [shape: bf16[2,4,32,8], index: 4, kind: input, shape index: {}]   ;;  %s3956_s5 = inlined_call_operand.vmem [shape: f32[2,4,1,8], index: 5, kind: input, shape index: {}]   ;;  %s3957_s6 = inlined_call_operand.vmem [shape: f32[2,4,1,8], index: 6, kind: input, shape index: {}]   ;;  %s3958_s7 = inlined_call_operand.vmem [shape: f32[2,4,1,8], index: 7, kind: input, shape index: {}]   ;;  %s3959_s8 = inlined_call_operand.vmem [shape: bf16[2,4,8,32], index: 8, kind: input, shape index: {}]   ;;  %s3960_s9 = inlined_call_operand.vmem [shape: f32[2,1,32], index: 9, kind: input, shape index: {}]   ;;  %s3961_s10 = inlined_call_operand.vmem [shape: f32[2,1,32], index: 10, kind: input, shape index: {}]   ;;  %s3962_s11 = inlined_call_operand.vmem [shape: f32[2,1,32], index: 11, kind: input, shape index: {}]   ;;  %s3963_s12 = inlined_call_operand.vmem [shape: f32[2,1,32], index: 12, kind: input, shape index: {}]   ;;  %s3964_s13 = inlined_call_operand.vmem [shape: f32[2,1,32], index: 13, kind: input, shape index: {}]   ;;  %s3965_s14 = inlined_call_operand.vmem [shape: bf16[2,32,64], index: 14, kind: input, shape index: {}]   ;;  %s3966_s15 = inlined_call_operand.vmem [shape: f32[2,1,64], index: 15, kind: input, shape index: {}]   ;;  %s3967_s16 = inlined_call_operand.vmem [shape: bf16[2,64,32], index: 16, kind: input, shape index: {}]   ;;  %s3968_s17 = inlined_call_operand.vmem [shape: f32[2,1,32], index: 17, kind: input, shape index: {}]   ;;  %s3969_s18 = inlined_call_operand.hbm [shape: f32[16,32], index: 18, kind: output, shape index: {}]  }
   0x1   :  { %3989 = sst [smem:[#allocation23_spill]] %s3951_s0 }
   0x2   :  { %3990 = sst [smem:[#allocation24_spill]] %s3952_s1 }
   0x3   :  { %3991 = sst [smem:[#allocation25_spill]] %s3953_s2 }
   0x4   :  { %3992 = sst [smem:[#allocation26_spill]] %s3954_s3 }
   0x5   :  { %3993 = sst [smem:[#allocation27_spill]] %s3955_s4 }
   0x6   :  { %3994 = sst [smem:[#allocation28_spill]] %s3956_s5 }
   0x7   :  { %3995 = sst [smem:[#allocation29_spill]] %s3957_s6 }
   0x8   :  { %3996 = sst [smem:[#allocation30_spill]] %s3958_s7 }
   0x9   :  { %3997 = sst [smem:[#allocation31_spill]] %s3959_s8 }
   0xa   :  { %3998 = sst [smem:[#allocation32_spill]] %s3960_s9 }
   0xb   :  { %3999 = sst [smem:[#allocation33_spill]] %s3963_s12 }
   0xc   :  { %4000 = sst [smem:[#allocation34_spill]] %s3965_s14 }
   0xd   :  { %4001 = sst [smem:[#allocation35_spill]] %s3966_s15 }
   0xe   :  { %4002 = sst [smem:[#allocation36_spill]] %s3967_s16 }
   0xf   :  { %4003 = sst [smem:[#allocation37_spill]] %s3968_s17 }
  0x10   :  { %4004 = sst [smem:[#allocation38_spill]] %s3969_s18 }
  0x11   :  { %23 = vsyncpa [#allocation4], 0 }
  0x12   :  { %25 = vsyncpa [#allocation4 + $0x1], 0  ;;  %s3461_s27 = smov 0   ;;  %s3463_s28 = smov 0  }
  0x13   :  { %s3465_s29 = smov 0   ;;  %s3467_s30 = smov 0  }
  0x14   :  { %s3469_s0 = smov 0   ;;  %s3471_s19 = smov 0  }
  0x15   :  { %s3473_s1 = smov 0   ;;  %s3475_s20 = smov 0  }
  0x16 LB: > { %4005 = sst [smem:[#allocation6_spill]] %s3332_s27  ;;  %s2777_s21 = sadd.s32 4294967295, %s3360_s20   ;;  %s3360_s20 = sphi %s3475_s20, %s31_s20   ;;  %s3356_s1 = sphi %s3473_s1, %s4068_s1   ;;  %s3352_s19 = sphi %s3471_s19, %s4067_s19   ;;  %s3348_s0 = sphi %s3469_s0, %s4066_s0   ;;  %s3344_s30 = sphi %s3467_s30, %s4065_s30   ;;  %s3340_s29 = sphi %s3465_s29, %s4064_s29   ;;  %s3336_s28 = sphi %s3463_s28, %s4063_s28   ;;  %s3332_s27 = sphi %s3461_s27, %s4062_s27  }
  0x17   : > { %4006 = sst [smem:[#allocation7_spill]] %s3336_s28  ;;  %s2778_s22 = sadd.s32 4294967294, %s3360_s20  }
  0x18   : > { %4007 = sst [smem:[#allocation8_spill]] %s3340_s29  ;;  %s40_s2 = sadd.s32 1, %s3352_s19 }
  0x19   : > { %4008 = sst [smem:[#allocation9_spill]] %s3344_s30  ;;  %p41_p0 = scmp.ge.s32.totalorder %s40_s2, 2 }
  0x1a   : > { %4009 = sst [smem:[#allocation10_spill]] %s3348_s0  ;;  %s43_s23 = sadd.s32 1, %s3356_s1 }
  0x1b   : > { %4010 = sst [smem:[#allocation11_spill]] %s3352_s19  ;;  %p528_p1 = scmp.ne.s32.totalorder %s3340_s29, %s3336_s28 }
  0x1c   : > { %4011 = sst [smem:[#allocation12_spill]] %s3356_s1  ;;  %p529_p2 = scmp.eq.s32.totalorder %s2777_s21, 3 }
  0x1d   : > { %4012 = sst [smem:[#allocation13_spill]] %s3360_s20  ;;  %s4070_s2 = smov (%p41_p0, %s40_s2), 0 }
  0x1e   : > { %4013 = sst [smem:[#allocation14_spill]] %s4070_s2  ;;  %s4072_s23 = smov (!%p41_p0, %s43_s23), %s3356_s1 }
  0x1f   : > { %p3510_p3 = por %p529_p2, %p528_p1  ;;  %p534_p4 = scmp.ne.s32.totalorder %s3336_s28, %s3332_s27 }
  0x20   : > { %p45_p5 = scmp.ge.s32.totalorder %s4072_s23, 2  ;;  %p535_p6 = scmp.eq.s32.totalorder %s2778_s22, 3 }
  0x21   : > { %s4014_s24 = scalar_select %p3510_p3, 1, 0 }
  0x22   : > { %p2781_p7 = scmp.ge.s32.totalorder %s3360_s20, 1  ;;  %p677_p8 = scmp.lt.s32.totalorder %s3360_s20, 5 }
  0x23   : > { %4015 = sst [smem:[#allocation15_spill]] %s4014_s24  ;;  %s4074_s23 = smov (%p45_p5, %s4072_s23), 0 }
  0x24   : > { %4016 = sst [smem:[#allocation16_spill]] %s4074_s23  ;;  %p3520_p9 = por %p535_p6, %p534_p4 }
  0x25   : > { %p678_p10 = pnand %p2781_p7, %p677_p8  ;;  %s515_s26 = ssub.s32 %s3356_s1, %s4074_s23 }
  0x26   : > { %s4017_s25 = scalar_select %p3520_p9, 1, 0 }
  0x27   : > { %s518_s21 = sadd.s32 1, %s3340_s29  ;;  %p516_p11 = scmp.eq.s32.totalorder %s515_s26, 0 }
  0x28   : > { %4018 = sst [smem:[#allocation17_spill]] %s4017_s25  ;;  %681 = sbr.rel (%p678_p10) target bundleno = 2381 (0x94d), region = 92 }
  0x29   : > { %s3528_s2 = scalar_select %p516_p11, %s3340_s29, %s518_s21  }
  0x2b   : > { %4019 = sst [smem:[#allocation18_spill]] %s3528_s2 }
  0x2f   : > { %s3975_s22 = sand.u32 1, %s3336_s28   ;;  %p796_p12 = scmp.lt.s32.totalorder %s3348_s0, 1 }
  0x30   : > { %s2782_s19 = sshll.u32 %s3975_s22, 3  ;;  %p803_p13 = scmp.lt.s32.totalorder %s3344_s30, 1 }
  0x31   : > { %s3536_s27 = scalar_select %p796_p12, %s3348_s0, 1 }
  0x32   : > { %s3539_s23 = scalar_select %p803_p13, %s3344_s30, 1 }
  0x33   : > { %s2783_s26 = sshll.u32 %s3536_s27, 3  ;;  %s4021_s20 = sld [smem:[#allocation23_spill]] }
  0x34   : > { %s2880_s24 = sshll.u32 %s3539_s23, 6  ;;  %s4022_s30 = sld [smem:[#allocation25_spill]] }
  0x35   : > { %s4023_s3 = sld [smem:[#allocation26_spill]]  ;;  %s4024_s4 = sld [smem:[#allocation27_spill]] }
  0x36   : > { %s4025_s5 = sld [smem:[#allocation28_spill]]  ;;  %s4027_s6 = sld [smem:[#allocation29_spill]] }
  0x37   : > { %s4029_s7 = sld [smem:[#allocation30_spill]]  ;;  %s2883_s1 = sshll.u32 %s3539_s23, 4 }
  0x38   : > { %s4031_s8 = sld [smem:[#allocation31_spill]]  ;;  %s2885_s9 = sshll.u32 %s3539_s23, 5 }
  0x39   : > { %s799_s18 = scalar_lea.vmem %s4021_s20, %s2783_s26  ;;  %s2790_s20 = sshll.u32 %s3539_s23, 2 }
  0x3a   : > { %s3553_s16 = scalar_lea.vmem %s4022_s30, %s2880_s24  ;;  %s4037_s15 = sld [smem:[#allocation37_spill]] }
  0x3b   : > { %s3558_s14 = scalar_lea.vmem %s4023_s3, %s2880_s24  ;;  %s3563_s25 = scalar_lea.vmem %s4024_s4, %s2880_s24 }
  0x3c   : > { %s3569_s28 = scalar_lea.vmem %s4025_s5, %s2790_s20  ;;  %s3574_s21 = scalar_lea.vmem %s4027_s6, %s2790_s20 }
  0x3d   : > { %4026 = sst [smem:[#allocation19_spill]] %s3569_s28  ;;  %s3579_s29 = scalar_lea.vmem %s4029_s7, %s2790_s20 }
  0x3e   : > { %4028 = sst [smem:[#allocation20_spill]] %s3574_s21  ;;  %s3585_s3 = scalar_lea.vmem %s4031_s8, %s2883_s1 }
  0x3f   : > { %4030 = sst [smem:[#allocation21_spill]] %s3579_s29  ;;  %s849_s24 = scalar_lea.vmem %s3964_s13, %s3539_s23 }
  0x40   : > { %4032 = sst [smem:[#allocation22_spill]] %s3585_s3  ;;  %s4035_s4 = sld [smem:[#allocation34_spill]] }
  0x41   : > { %s4036_s28 = sld [smem:[#allocation35_spill]]  ;;  %s865_s21 = scalar_lea.vmem %s4037_s15, %s3539_s23 }
  0x42   : > { %s4038_s7 = sld [smem:[#allocation36_spill]]  ;;  %s3626_s29 = scalar_lea.vmem [#allocation3], %s2782_s19 }
  0x43   : > { %s4039_s2 = sld [smem:[#allocation9_spill]] }
  0x46   : > { %s3610_s22 = scalar_lea.vmem %s4035_s4, %s2883_s1 }
  0x47   : > { %s857_s30 = scalar_lea.vmem %s4036_s28, %s3539_s23 }
  0x48   : > { %s3624_s12 = scalar_lea.vmem %s4038_s7, %s2885_s9 }
  0x49   : > { %p2799_p0 = scmp.ne.s32.totalorder %s4039_s2, 0 }
  0x4a   : > { %v871_v0 = vld [vmem:[%s799_s18] sm:$0xff] (!%p2799_p0)  ;;  %vm872_vm0 = vcmask (!%p2799_p0), 261120   ;;  %v874_v1 = vlaneseq (!%p2799_p0)  ;;  %s4040_s1 = sld [smem:[#allocation24_spill]] (!%p2799_p0)  ;;  %v3362_v5 = vmov (!%p2799_p0), -1e+30   ;;  %vm888_vm2 = vcmask (!%p2799_p0), 64512  }
  0x4b   : > { %870 = sbr.rel (%p2799_p0) target bundleno = 85 (0x55), region = 96  ;;  %873 = vst.msk [vmem:[%s3626_s29] sm:$0xff] (!%p2799_p0), %vm872_vm0, %v871_v0 }
  0x4c   : > { %v875_v2 = vshrl.u32 (!%p2799_p0), %v874_v1, 7  ;;  %v877_v3 = vand.u32 (!%p2799_p0), 127, %v874_v1 }
  0x4e   : > { %vm878_vm1 = vcmp.le.s32.totalorder (!%p2799_p0), %v877_v3, %v875_v2 }
  0x4f   : > { %v879_v6 = vsel (!%p2799_p0), %vm878_vm1, 0.0, %v3362_v5 }
  0x50   : > { %s4041_s26 = scalar_lea.vmem (!%p2799_p0), %s4040_s1, %s3536_s27 }
  0x51   : > { %v2800_v4 = vld [vmem:[%s4041_s26] ss:$0 sm:$0xff] (!%p2799_p0) }
  0x52   : > { %v887_v7 = vadd.f32 %v2800_v4, %v879_v6 }
  0x54   : > { %889 = vst.msk [vmem:[#allocation2] sm:$0xff] %vm888_vm2, %v887_v7 }
  0x55 PF: > { %v3636_v8 = vld [vmem:[%s3626_s29] sm:$0xff]  ;;  %vm892_vm3 = vcmask 261120   ;;  %v3216_v15 = vld [vmem:[%s3553_s16] sm:$0xff]   ;;  %v3363_v17 = vmov 0.0   ;;  %v3219_v19 = vld [vmem:[%s3553_s16 + $0x18] sm:$0xff]   ;;  %vm3364_vm4 = vmmov 0   ;;  %s4042_s18 = scalar_lea.vmem %s3961_s10, %s3539_s23  ;;  %s4043_s15 = scalar_lea.vmem %s3962_s11, %s3539_s23 }
  0x56   : > { %v893_v9 = vsel %vm892_vm3, %v3636_v8, 0.0  ;;  %v3217_v16 = vld [vmem:[%s3553_s16 + $0x10] sm:$0xff]   ;;  %2954 = vmatprep.subr.bf16.mxu0 %v3363_v17  ;;  %2962 = vmatprep.subr.bf16.mxu1 %v3363_v17  ;;  %v3218_v18 = vld [vmem:[%s3553_s16 + $0x8] sm:$0xff]   ;;  %v2801_v24 = vld [vmem:[%s4042_s18] ss:$0 sm:$0xff]  ;;  %vm1691_vm5 = vcmask 64512  }
  0x57   : > { %894 = vadd.xlane.f32.xlu0 %v893_v9  ;;  %2955 = vmatpush3.bf16.msra.mxu0 %v3216_v15  ;;  %v2802_v26 = vld [vmem:[%s4043_s15] ss:$0 sm:$0xff]  ;;  %v3221_v30 = vld [vmem:[%s3553_s16 + $0x30] sm:$0xff]   ;;  %v3222_v32 = vld [vmem:[%s3553_s16 + $0x28] sm:$0xff]   ;;  %vm1939_vm6 = vcmask 1043456   ;;  %s4047_s4 = sld [smem:[#allocation22_spill]] }
  0x58   : > { %2963 = vmatpush3.bf16.msra.mxu1 %v3217_v16  ;;  %2956 = vmatprep.subr.bf16.mxu0 %v3363_v17  ;;  %v3220_v29 = vld [vmem:[%s3553_s16 + $0x20] sm:$0xff]   ;;  %v3223_v33 = vld [vmem:[%s3553_s16 + $0x38] sm:$0xff]   ;;  %v3225_v35 = vld [vmem:[%s3558_s14 + $0x10] sm:$0xff]   ;;  %s4045_s16 = sld [smem:[#allocation19_spill]]  ;;  %s4048_s6 = sld [smem:[#allocation32_spill]]  ;;  %vm2459_vm7 = vcmask 523264  }
  0x59   : > { %2964 = vmatprep.subr.bf16.mxu1 %v3363_v17  ;;  %2958 = vmatprep.mubr.msk.bf16.mxu0 %vm3364_vm4, %v3363_v17  ;;  %v3224_v34 = vld [vmem:[%s3558_s14] sm:$0xff]   ;;  %v3226_v36 = vld [vmem:[%s3558_s14 + $0x8] sm:$0xff]   ;;  %v3227_v37 = vld [vmem:[%s3558_s14 + $0x18] sm:$0xff]   ;;  %s4050_s17 = sld [smem:[#allocation33_spill]]  ;;  %s4052_s1 = sld [smem:[#allocation10_spill]] }
  0x5a   : > { %2966 = vmatprep.mubr.msk.bf16.mxu1 %vm3364_vm4, %v3363_v17  ;;  %v3228_v38 = vld [vmem:[%s3558_s14 + $0x20] sm:$0xff]   ;;  %v3229_v39 = vld [vmem:[%s3558_s14 + $0x30] sm:$0xff]   ;;  %v3230_v40 = vld [vmem:[%s3558_s14 + $0x28] sm:$0xff]   ;;  %s3365_s28 = smov [#allocation3]  }
  0x5b   : > { %2957 = vmatpush3.bf16.msra.mxu0 %v3218_v18  ;;  %v3231_v41 = vld [vmem:[%s3558_s14 + $0x38] sm:$0xff]   ;;  %v3232_v42 = vld [vmem:[%s3563_s25] sm:$0xff]   ;;  %v3233_v43 = vld [vmem:[%s3563_s25 + $0x10] sm:$0xff]   ;;  %s4044_s14 = sld [smem:[#allocation20_spill]] }
  0x5c   : > { %2965 = vmatpush3.bf16.msra.mxu1 %v3219_v19  ;;  %2970 = vmatprep.subr.bf16.mxu0 %v3363_v17  ;;  %v3234_v44 = vld [vmem:[%s3563_s25 + $0x8] sm:$0xff]   ;;  %v3235_v45 = vld [vmem:[%s3563_s25 + $0x18] sm:$0xff]   ;;  %v3236_v46 = vld [vmem:[%s3563_s25 + $0x20] sm:$0xff]  }
  0x5d   : > { %2978 = vmatprep.subr.bf16.mxu1 %v3363_v17  ;;  %v3237_v47 = vld [vmem:[%s3563_s25 + $0x30] sm:$0xff]   ;;  %v3238_v48 = vld [vmem:[%s3563_s25 + $0x28] sm:$0xff]   ;;  %v3239_v49 = vld [vmem:[%s3563_s25 + $0x38] sm:$0xff]   ;;  %s4046_s25 = sld [smem:[#allocation21_spill]] }
  0x5e   : > { %v2803_v18 = vld [vmem:[%s4045_s16] ss:$0 sm:$0xff]  ;;  %v2804_v19 = vld [vmem:[%s4045_s16 + $0x1] ss:$0 sm:$0xff]  ;;  %s4049_s0 = scalar_lea.vmem %s4048_s6, %s3539_s23  ;;  %s3270_s6 = sshll.u32 %s3365_s28, 4  ;;  %s3271_s6 = int_to_ptr.vmem [resolvable:$false] %s3270_s6 }
  0x5f   : > { %s4051_s2 = scalar_lea.vmem %s4050_s17, %s3539_s23  ;;  %s2877_s15 = sshll.u32 %s4052_s1, 7 }
  0x61   : > { %v2819_v2 = vld [vmem:[%s4044_s14] ss:$0 sm:$0xff]  ;;  %v2820_v3 = vld [vmem:[%s4044_s14 + $0x1] ss:$0 sm:$0xff] }
  0xe4   : > { %v895_v10 = vpop.xlane.xlu0 %894 }
  0xe5   : > { %v897_v11 = vmul.f32 0.03125, %v895_v10 }
  0xe7   : > { %v898_v12 = vsub.f32 %v3636_v8, %v897_v11 }
  0xe9   : > { %v899_v13 = vmul.f32 %v898_v12, %v898_v12 }
  0xeb   : > { %v900_v14 = vsel %vm892_vm3, %v899_v13, 0.0 }
  0xec   : > { %901 = vadd.xlane.f32.xlu0 %v900_v14 }
 0x179   : > { %v902_v20 = vpop.xlane.xlu0 %901 }
 0x17a   : > { %v903_v21 = vmul.f32 0.03125, %v902_v20 }
 0x17c   : > { %v904_v22 = vadd.f32 1e-05, %v903_v21 }
 0x17e   : > { %3246 = vrsqrt.f32 %v904_v22  ;;  %v2821_v22 = vld [vmem:[%s4044_s14 + $0x2] ss:$0 sm:$0xff] }
 0x188   : > { %v3247_v23 = vpop.eup %3246 }
 0x189   : > { %v906_v25 = vmul.f32 %v3247_v23, %v898_v12  ;;  %v2822_v23 = vld [vmem:[%s4044_s14 + $0x3] ss:$0 sm:$0xff] }
 0x18b   : > { %v914_v27 = vmul.f32 %v2801_v24, %v906_v25 }
 0x18d   : > { %v922_v28 = vadd.f32 %v2802_v26, %v914_v27 }
 0x18f   : > { %v3668_v31 = vpack.c.bf16 %v922_v28, %v922_v28 }
 0x191   : > { %2959 = vmatmul.mubr.msk.bf16.vlgmr.msra.gmra.mrb[0].mxu0 %vm892_vm3, %v3668_v31  ;;  %2967 = vmatmul.mubr.msk.bf16.vlgmr.msra.gmra.mrb[0].mxu1 %vm892_vm3, %v3668_v31 }
 0x192   : > { %2971 = vmatpush3.bf16.msra.mxu0 %v3220_v29  ;;  %2979 = vmatpush3.bf16.msra.mxu1 %v3221_v30 }
 0x193   : > { %2972 = vmatprep.subr.bf16.mxu0 %v3363_v17  ;;  %2980 = vmatprep.subr.bf16.mxu1 %v3363_v17 }
 0x194   : > { %2974 = vmatprep.mubr.msk.bf16.mxu0 %vm3364_vm4, %v3363_v17  ;;  %2982 = vmatprep.mubr.msk.bf16.mxu1 %vm3364_vm4, %v3363_v17 }
 0x196   : > { %2973 = vmatpush3.bf16.msra.mxu0 %v3222_v32  ;;  %2981 = vmatpush3.bf16.msra.mxu1 %v3223_v33 }
 0x197   : > { %2986 = vmatprep.subr.bf16.mxu0 %v3363_v17  ;;  %2994 = vmatprep.subr.bf16.mxu1 %v3363_v17 }
 0x199   : > { %2975 = vmatmul.mubr.msk.bf16.vlgmr.msra.gmra.mrb[4].mxu0 %vm892_vm3, %v3668_v31  ;;  %2983 = vmatmul.mubr.msk.bf16.vlgmr.msra.gmra.mrb[4].mxu1 %vm892_vm3, %v3668_v31 }
 0x19a   : > { %2987 = vmatpush3.bf16.msra.mxu0 %v3224_v34  ;;  %2995 = vmatpush3.bf16.msra.mxu1 %v3225_v35 }
 0x19b   : > { %2988 = vmatprep.subr.bf16.mxu0 %v3363_v17  ;;  %2996 = vmatprep.subr.bf16.mxu1 %v3363_v17 }
 0x19c   : > { %2990 = vmatprep.mubr.msk.bf16.mxu0 %vm3364_vm4, %v3363_v17  ;;  %2998 = vmatprep.mubr.msk.bf16.mxu1 %vm3364_vm4, %v3363_v17 }
 0x19e   : > { %2989 = vmatpush3.bf16.msra.mxu0 %v3226_v36  ;;  %2997 = vmatpush3.bf16.msra.mxu1 %v3227_v37 }
 0x19f   : > { %3002 = vmatprep.subr.bf16.mxu0 %v3363_v17  ;;  %3010 = vmatprep.subr.bf16.mxu1 %v3363_v17 }
 0x1a1   : > { %2991 = vmatmul.mubr.msk.bf16.vlgmr.msra.gmra.mrb[8].mxu0 %vm892_vm3, %v3668_v31  ;;  %2999 = vmatmul.mubr.msk.bf16.vlgmr.msra.gmra.mrb[8].mxu1 %vm892_vm3, %v3668_v31 }
 0x1a2   : > { %3003 = vmatpush3.bf16.msra.mxu0 %v3228_v38  ;;  %3011 = vmatpush3.bf16.msra.mxu1 %v3229_v39 }
 0x1a3   : > { %3004 = vmatprep.subr.bf16.mxu0 %v3363_v17  ;;  %3012 = vmatprep.subr.bf16.mxu1 %v3363_v17 }
 0x1a4   : > { %3006 = vmatprep.mubr.msk.bf16.mxu0 %vm3364_vm4, %v3363_v17  ;;  %3014 = vmatprep.mubr.msk.bf16.mxu1 %vm3364_vm4, %v3363_v17 }
 0x1a6   : > { %3005 = vmatpush3.bf16.msra.mxu0 %v3230_v40  ;;  %3013 = vmatpush3.bf16.msra.mxu1 %v3231_v41  ;;  %v2805_v40 = vld [vmem:[%s4045_s16 + $0x2] ss:$0 sm:$0xff]  ;;  %v2806_v41 = vld [vmem:[%s4045_s16 + $0x3] ss:$0 sm:$0xff] }
 0x1a7   : > { %3018 = vmatprep.subr.bf16.mxu0 %v3363_v17  ;;  %3026 = vmatprep.subr.bf16.mxu1 %v3363_v17 }
 0x1a9   : > { %3007 = vmatmul.mubr.msk.bf16.vlgmr.msra.gmra.mrb[12].mxu0 %vm892_vm3, %v3668_v31  ;;  %3015 = vmatmul.mubr.msk.bf16.vlgmr.msra.gmra.mrb[12].mxu1 %vm892_vm3, %v3668_v31 }
 0x1aa   : > { %3019 = vmatpush3.bf16.msra.mxu0 %v3232_v42  ;;  %3027 = vmatpush3.bf16.msra.mxu1 %v3233_v43 }
 0x1ab   : > { %3020 = vmatprep.subr.bf16.mxu0 %v3363_v17  ;;  %3028 = vmatprep.subr.bf16.mxu1 %v3363_v17 }
 0x1ac   : > { %3022 = vmatprep.mubr.msk.bf16.mxu0 %vm3364_vm4, %v3363_v17  ;;  %3030 = vmatprep.mubr.msk.bf16.mxu1 %vm3364_vm4, %v3363_v17 }
 0x1ae   : > { %3021 = vmatpush3.bf16.msra.mxu0 %v3234_v44  ;;  %3029 = vmatpush3.bf16.msra.mxu1 %v3235_v45  ;;  %v2835_v44 = vld [vmem:[%s4046_s25] ss:$0 sm:$0xff]  ;;  %v2836_v45 = vld [vmem:[%s4046_s25 + $0x1] ss:$0 sm:$0xff] }
 0x1af   : > { %3034 = vmatprep.subr.bf16.mxu0 %v3363_v17  ;;  %3042 = vmatprep.subr.bf16.mxu1 %v3363_v17 }
 0x1b1   : > { %3023 = vmatmul.mubr.msk.bf16.vlgmr.msra.gmra.mrb[16].mxu0 %vm892_vm3, %v3668_v31  ;;  %3031 = vmatmul.mubr.msk.bf16.vlgmr.msra.gmra.mrb[16].mxu1 %vm892_vm3, %v3668_v31 }
 0x1b2   : > { %3035 = vmatpush3.bf16.msra.mxu0 %v3236_v46  ;;  %3043 = vmatpush3.bf16.msra.mxu1 %v3237_v47 }
 0x1b3   : > { %3036 = vmatprep.subr.bf16.mxu0 %v3363_v17  ;;  %3044 = vmatprep.subr.bf16.mxu1 %v3363_v17 }
 0x1b4   : > { %3038 = vmatprep.mubr.msk.bf16.mxu0 %vm3364_vm4, %v3363_v17  ;;  %3046 = vmatprep.mubr.msk.bf16.mxu1 %vm3364_vm4, %v3363_v17 }
 0x1b6   : > { %3037 = vmatpush3.bf16.msra.mxu0 %v3238_v48  ;;  %3045 = vmatpush3.bf16.msra.mxu1 %v3239_v49 }
 0x1b7   : > { %3050 = vmatprep.subr.bf16.mxu0 %v3363_v17  ;;  %3056 = vmatprep.subr.bf16.mxu1 %v3363_v17 }
 0x1b9   : > { %3039 = vmatmul.mubr.msk.bf16.vlgmr.msra.gmra.mrb[20].mxu0 %vm892_vm3, %v3668_v31  ;;  %3047 = vmatmul.mubr.msk.bf16.vlgmr.msra.gmra.mrb[20].mxu1 %vm892_vm3, %v3668_v31 }
 0x1ba   : > { %3052 = vmatprep.mubr.msk.bf16.mxu0 %vm3364_vm4, %v3363_v17  ;;  %3058 = vmatprep.mubr.msk.bf16.mxu1 %vm3364_vm4, %v3363_v17 }
 0x264   : > { %v1017_v50 = vpop.f32.mrb[0].mxu0  ;;  %v1069_v51 = vpop.f32.mrb[0].mxu1 }
 0x265   : > { %v2960_v52 = vpop.f32.mrb[1].mxu0  ;;  %v2968_v53 = vpop.f32.mrb[1].mxu1  ;;  %v1018_v24 = vadd.f32 %v2803_v18, %v1017_v50  ;;  %v1070_v25 = vadd.f32 %v2804_v19, %v1069_v51 }
 0x266   : > { %v1020_v54 = vpop.f32.mrb[2].mxu0  ;;  %v1072_v55 = vpop.f32.mrb[2].mxu1 }
 0x267   : > { %v2961_v56 = vpop.f32.mrb[3].mxu0  ;;  %v2969_v57 = vpop.f32.mrb[3].mxu1  ;;  %v1683_v34 = vpack.c.bf16 %v1018_v24, %v1018_v24  ;;  %v1684_v35 = vpack.c.bf16 %v1070_v25, %v1070_v25 }
 0x26c   : > { %v1121_v58 = vpop.f32.mrb[4].mxu0  ;;  %v1173_v59 = vpop.f32.mrb[4].mxu1 }
 0x26d   : > { %v2976_v60 = vpop.f32.mrb[5].mxu0  ;;  %v2984_v61 = vpop.f32.mrb[5].mxu1  ;;  %v1122_v46 = vadd.f32 %v2805_v40, %v1121_v58  ;;  %v1174_v47 = vadd.f32 %v2806_v41, %v1173_v59 }
 0x26e   : > { %v1124_v62 = vpop.f32.mrb[6].mxu0  ;;  %v1176_v63 = vpop.f32.mrb[6].mxu1 }
 0x26f   : > { %v2977_v0 = vpop.f32.mrb[7].mxu0  ;;  %v2985_v1 = vpop.f32.mrb[7].mxu1  ;;  %v1685_v56 = vpack.c.bf16 %v1122_v46, %v1122_v46  ;;  %v1686_v57 = vpack.c.bf16 %v1174_v47, %v1174_v47 }
 0x274   : > { %v1269_v4 = vpop.f32.mrb[8].mxu0  ;;  %v1321_v5 = vpop.f32.mrb[8].mxu1 }
 0x275   : > { %v1270_v6 = vadd.f32 %v2819_v2, %v1269_v4  ;;  %v1322_v7 = vadd.f32 %v2820_v3, %v1321_v5  ;;  %v2992_v9 = vpop.f32.mrb[9].mxu0  ;;  %v3000_v10 = vpop.f32.mrb[9].mxu1 }
 0x276   : > { %v1272_v11 = vpop.f32.mrb[10].mxu0  ;;  %v1324_v12 = vpop.f32.mrb[10].mxu1 }
 0x277   : > { %v1687_v13 = vpack.c.bf16 %v1270_v6, %v1270_v6  ;;  %v1688_v14 = vpack.c.bf16 %v1322_v7, %v1322_v7  ;;  %v2993_v15 = vpop.f32.mrb[11].mxu0  ;;  %v3001_v16 = vpop.f32.mrb[11].mxu1  ;;  %v891_v11 = vld [vmem:[#allocation2] sm:$0xff] }
 0x279   : > { %v1696_v20 = vsel %vm1691_vm5, %v1687_v13, 0  ;;  %v1742_v21 = vsel %vm1691_vm5, %v1688_v14, 0 }
 0x27a   : > { %3051 = vmatpush3.bf16.xpose.msra.mxu0 %v1696_v20  ;;  %3057 = vmatpush3.bf16.xpose.msra.mxu1 %v1742_v21 }
 0x27b   : > { %3062 = vmatprep.subr.bf16.mxu0 %v3363_v17  ;;  %3068 = vmatprep.subr.bf16.mxu1 %v3363_v17 }
 0x27c   : > { %v1373_v26 = vpop.f32.mrb[12].mxu0  ;;  %v1425_v27 = vpop.f32.mrb[12].mxu1 }
 0x27d   : > { %v1374_v28 = vadd.f32 %v2821_v22, %v1373_v26  ;;  %v1426_v29 = vadd.f32 %v2822_v23, %v1425_v27  ;;  %v3008_v30 = vpop.f32.mrb[13].mxu0  ;;  %v3016_v31 = vpop.f32.mrb[13].mxu1 }
 0x27e   : > { %v1376_v32 = vpop.f32.mrb[14].mxu0  ;;  %v1428_v33 = vpop.f32.mrb[14].mxu1 }
 0x27f   : > { %v1689_v36 = vpack.c.bf16 %v1374_v28, %v1374_v28  ;;  %v1690_v37 = vpack.c.bf16 %v1426_v29, %v1426_v29  ;;  %v3009_v38 = vpop.f32.mrb[15].mxu0  ;;  %v3017_v39 = vpop.f32.mrb[15].mxu1 }
 0x281   : > { %v1788_v42 = vsel %vm1691_vm5, %v1689_v36, 0  ;;  %v1834_v43 = vsel %vm1691_vm5, %v1690_v37, 0  ;;  %3053 = vmatmul.mubr.msk.bf16.vlgmr.msra.gmra.mrb[24].mxu0 %vm1691_vm5, %v1683_v34  ;;  %3059 = vmatmul.mubr.msk.bf16.vlgmr.msra.gmra.mrb[24].mxu1 %vm1691_vm5, %v1684_v35 }
 0x282   : > { %3063 = vmatpush3.bf16.xpose.msra.mxu0 %v1788_v42  ;;  %3069 = vmatpush3.bf16.xpose.msra.mxu1 %v1834_v43 }
 0x283   : > { %3064 = vmatprep.mubr.msk.bf16.mxu0 %vm3364_vm4, %v3363_v17  ;;  %3070 = vmatprep.mubr.msk.bf16.mxu1 %vm3364_vm4, %v3363_v17 }
 0x284   : > { %v1521_v48 = vpop.f32.mrb[16].mxu0  ;;  %v1573_v49 = vpop.f32.mrb[16].mxu1  ;;  %3074 = vmatprep.subr.bf16.mxu0 %v3363_v17  ;;  %3080 = vmatprep.subr.bf16.mxu1 %v3363_v17 }
 0x285   : > { %v1522_v50 = vadd.f32 %v2835_v44, %v1521_v48  ;;  %v1574_v51 = vadd.f32 %v2836_v45, %v1573_v49  ;;  %v3024_v52 = vpop.f32.mrb[17].mxu0  ;;  %v3032_v53 = vpop.f32.mrb[17].mxu1 }
 0x286   : > { %v1524_v54 = vpop.f32.mrb[18].mxu0  ;;  %v1576_v55 = vpop.f32.mrb[18].mxu1 }
 0x287   : > { %v1932_v58 = vpack.c.bf16 %v1522_v50, %v1522_v50  ;;  %v1933_v59 = vpack.c.bf16 %v1574_v51, %v1574_v51  ;;  %v3025_v60 = vpop.f32.mrb[19].mxu0  ;;  %v3033_v61 = vpop.f32.mrb[19].mxu1 }
 0x288   : > { %v2837_v61 = vld [vmem:[%s4046_s25 + $0x2] ss:$0 sm:$0xff] }
 0x289   : > { %v1941_v62 = vsel %vm1939_vm6, %v1932_v58, 0  ;;  %v1987_v63 = vsel %vm1939_vm6, %v1933_v59, 0  ;;  %3065 = vmatmul.mubr.msk.bf16.vlgmr.msra.gmra.mrb[28].mxu0 %vm1691_vm5, %v1685_v56  ;;  %3071 = vmatmul.mubr.msk.bf16.vlgmr.msra.gmra.mrb[28].mxu1 %vm1691_vm5, %v1686_v57 }
 0x28a   : > { %3075 = vmatpush3.bf16.msra.mxu0 %v1941_v62  ;;  %3081 = vmatpush3.bf16.msra.mxu1 %v1987_v63 }
 0x28b   : > { %3076 = vmatprep.mubr.msk.bf16.mxu0 %vm3364_vm4, %v3363_v17  ;;  %3086 = vmatprep.subr.bf16.mxu0 %v3363_v17 }
 0x28c   : > { %v3787_v0 = vpop.f32.mrb[20].mxu0  ;;  %v3789_v1 = vpop.f32.mrb[20].mxu1  ;;  %3082 = vmatprep.mubr.msk.bf16.mxu1 %vm3364_vm4, %v3363_v17  ;;  %3092 = vmatprep.subr.bf16.mxu1 %v3363_v17 }
 0x28d   : > { %v3040_v2 = vpop.f32.mrb[21].mxu0  ;;  %v3048_v3 = vpop.f32.mrb[21].mxu1  ;;  %v1626_v62 = vadd.f32 %v2837_v61, %v3787_v0 }
 0x28e   : > { %v1628_v4 = vpop.f32.mrb[22].mxu0  ;;  %v1680_v5 = vpop.f32.mrb[22].mxu1  ;;  %v2838_v2 = vld [vmem:[%s4046_s25 + $0x3] ss:$0 sm:$0xff]  ;;  %s4057_s25 = sld [smem:[#allocation38_spill]] }
 0x28f   : > { %v3041_v6 = vpop.f32.mrb[23].mxu0  ;;  %v3049_v7 = vpop.f32.mrb[23].mxu1  ;;  %v1934_v5 = vpack.c.bf16 %v1626_v62, %v1626_v62 }
 0x290   : > { %v1678_v6 = vadd.f32 %v2838_v2, %v3789_v1 }
 0x354   : > { %v1732_v9 = vpop.f32.mrb[24].mxu0  ;;  %v1778_v10 = vpop.f32.mrb[24].mxu1 }
 0x355   : > { %v1876_v12 = vmul.f32 0.35355338, %v1732_v9  ;;  %v1877_v13 = vmul.f32 0.35355338, %v1778_v10  ;;  %v3054_v14 = vpop.f32.mrb[25].mxu0  ;;  %v3060_v15 = vpop.f32.mrb[25].mxu1 }
 0x356   : > { %v1735_v16 = vpop.f32.mrb[26].mxu0  ;;  %v1781_v18 = vpop.f32.mrb[26].mxu1 }
 0x357   : > { %v3055_v19 = vpop.f32.mrb[27].mxu0  ;;  %v3061_v20 = vpop.f32.mrb[27].mxu1  ;;  %v1880_v21 = vadd.f32 %v1876_v12, %v891_v11  ;;  %v1881_v22 = vadd.f32 %v1877_v13, %v891_v11  ;;  %v1935_v12 = vpack.c.bf16 %v1678_v6, %v1678_v6  ;;  %v2125_v16 = vld [vmem:[%s4047_s4] sm:$0xf] }
 0x359   : > { %v1884_v23 = vsel %vm1691_vm5, %v1880_v21, -inf  ;;  %v1887_v26 = vsel %vm1691_vm5, %v1881_v22, -inf  ;;  %v2079_v1 = vsel %vm1939_vm6, %v1935_v12, 0 }
 0x35a   : > { %1885 = vmax.xlane.f32.xlu1 %v1884_v23  ;;  %v2126_v23 = vld [vmem:[%s4047_s4 + $0x4] sm:$0xf] }
 0x35c   : > { %v1824_v24 = vpop.f32.mrb[28].mxu0  ;;  %v1870_v25 = vpop.f32.mrb[28].mxu1 }
 0x35d   : > { %v1878_v27 = vmul.f32 0.35355338, %v1824_v24  ;;  %v1879_v28 = vmul.f32 0.35355338, %v1870_v25  ;;  %v3066_v29 = vpop.f32.mrb[29].mxu0  ;;  %v3072_v30 = vpop.f32.mrb[29].mxu1 }
 0x35e   : > { %v1873_v31 = vpop.f32.mrb[30].mxu1  ;;  %1888 = vmax.xlane.f32.xlu1 %v1887_v26  ;;  %v1827_v32 = vpop.f32.mrb[30].mxu0  ;;  %v2179_v24 = vsel %vm1939_vm6, %v2126_v23, 0  ;;  %v2127_v25 = vld [vmem:[%s4047_s4 + $0x8] sm:$0xf] }
 0x35f   : > { %v3067_v33 = vpop.f32.mrb[31].mxu0  ;;  %v3073_v34 = vpop.f32.mrb[31].mxu1  ;;  %v1883_v35 = vadd.f32 %v1879_v28, %v891_v11  ;;  %v1882_v36 = vadd.f32 %v1878_v27, %v891_v11  ;;  %v2033_v11 = vsel %vm1939_vm6, %v1934_v5, 0  ;;  %v2225_v29 = vsel %vm1939_vm6, %v2127_v25, 0  ;;  %v2128_v31 = vld [vmem:[%s4047_s4 + $0xc] sm:$0xf]  ;;  %s3894_s4 = scalar_lea.hbm %s4057_s25, %s2877_s15 }
 0x361   : > { %v1893_v37 = vsel %vm1691_vm5, %v1883_v35, -inf  ;;  %v1890_v38 = vsel %vm1691_vm5, %v1882_v36, -inf }
 0x362   : > { %1894 = vmax.xlane.f32.xlu1 %v1893_v37  ;;  %1891 = vmax.xlane.f32.xlu0 %v1890_v38 }
 0x3e7   : > { %v1886_v39 = vpop.xlane.xlu1 %1885 }
 0x3e8   : > { %v1896_v40 = vsub.f32 %v1880_v21, %v1886_v39  ;;  %v2133_v21 = vsel %vm1939_vm6, %v2125_v16, 0 }
 0x3ea   : > { %v1900_v41 = vmul.f32 1.442695, %v1896_v40 }
 0x3eb   : > { %v1889_v42 = vpop.xlane.xlu1 %1888 }
 0x3ec   : > { %3248 = vpow2.f32 %v1900_v41  ;;  %v1897_v43 = vsub.f32 %v1881_v22, %v1889_v42 }
 0x3ee   : > { %v1902_v44 = vmul.f32 1.442695, %v1897_v43 }
 0x3ef   : > { %v1895_v45 = vpop.xlane.xlu1 %1894  ;;  %v1892_v46 = vpop.xlane.xlu0 %1891 }
 0x3f0   : > { %3250 = vpow2.f32 %v1902_v44  ;;  %v1899_v47 = vsub.f32 %v1883_v35, %v1895_v45  ;;  %v1898_v48 = vsub.f32 %v1882_v36, %v1892_v46  ;;  %v2271_v36 = vsel %vm1939_vm6, %v2128_v31, 0 }
 0x3f2   : > { %v1906_v49 = vmul.f32 1.442695, %v1899_v47  ;;  %v1904_v50 = vmul.f32 1.442695, %v1898_v48 }
 0x3f4   : > { %3252 = vpow2.f32 %v1906_v49 }
 0x3f5   : > { %3254 = vpow2.f32 %v1904_v50 }
 0x3f6   : > { %v3249_v51 = vpop.eup %3248 }
 0x3f7   : > { %v1908_v52 = vsel %vm1691_vm5, %v3249_v51, 0.0 }
 0x3f8   : > { %1909 = vadd.xlane.f32.xlu0 %v1908_v52 }
 0x3fa   : > { %v3251_v53 = vpop.eup %3250 }
 0x3fb   : > { %v1911_v54 = vsel %vm1691_vm5, %v3251_v53, 0.0 }
 0x3fc   : > { %1912 = vadd.xlane.f32.xlu1 %v1911_v54 }
 0x3fe   : > { %v3253_v55 = vpop.eup %3252 }
 0x3ff   : > { %v3255_v56 = vpop.eup %3254  ;;  %v1917_v57 = vsel %vm1691_vm5, %v3253_v55, 0.0 }
 0x400   : > { %1918 = vadd.xlane.f32.xlu1 %v1917_v57  ;;  %v1914_v58 = vsel %vm1691_vm5, %v3255_v56, 0.0 }
 0x401   : > { %1915 = vadd.xlane.f32.xlu0 %v1914_v58 }
 0x485   : > { %v1910_v59 = vpop.xlane.xlu0 %1909 }
 0x486   : > { %3256 = vrcp.f32 %v1910_v59 }
 0x489   : > { %v1913_v60 = vpop.xlane.xlu1 %1912 }
 0x48a   : > { %3258 = vrcp.f32 %v1913_v60 }
 0x48d   : > { %v1919_v63 = vpop.xlane.xlu1 %1918 }
 0x48e   : > { %3260 = vrcp.f32 %v1919_v63  ;;  %v1916_v3 = vpop.xlane.xlu0 %1915 }
 0x48f   : > { %3262 = vrcp.f32 %v1916_v3 }
 0x490   : > { %v3257_v4 = vpop.eup %3256 }
 0x491   : > { %v1924_v7 = vmul.f32 %v3257_v4, %v3249_v51 }
 0x493   : > { %v1928_v9 = vpack.c.bf16 %v1924_v7, %v1924_v7 }
 0x494   : > { %v3259_v10 = vpop.eup %3258 }
 0x495   : > { %v1925_v13 = vmul.f32 %v3259_v10, %v3251_v53  ;;  %3077 = vmatmul.mubr.msk.bf16.vlgmr.msra.gmra.mrb[32].mxu0 %vm1691_vm5, %v1928_v9 }
 0x496   : > { %3087 = vmatpush3.bf16.msra.mxu0 %v2033_v11  ;;  %3088 = vmatprep.mubr.msk.bf16.mxu0 %vm3364_vm4, %v3363_v17  ;;  %v2863_v11 = vld [vmem:[%s4049_s0] ss:$0 sm:$0xff]  ;;  %s3272_s0 = scalar_lea.vmem %s3271_s6, 256 }
 0x497   : > { %v1929_v0 = vpack.c.bf16 %v1925_v13, %v1925_v13  ;;  %3098 = vmatprep.subr.bf16.mxu0 %v3363_v17 }
 0x498   : > { %v3261_v14 = vpop.eup %3260 }
 0x499   : > { %v3263_v15 = vpop.eup %3262  ;;  %3083 = vmatmul.mubr.msk.bf16.vlgmr.msra.gmra.mrb[32].mxu1 %vm1691_vm5, %v1929_v0  ;;  %v1927_v19 = vmul.f32 %v3261_v14, %v3253_v55 }
 0x49a   : > { %v1926_v18 = vmul.f32 %v3263_v15, %v3255_v56  ;;  %3093 = vmatpush3.bf16.msra.mxu1 %v2079_v1  ;;  %3094 = vmatprep.mubr.msk.bf16.mxu1 %vm3364_vm4, %v3363_v17 }
 0x49b   : > { %3104 = vmatprep.subr.bf16.mxu1 %v3363_v17  ;;  %v1931_v22 = vpack.c.bf16 %v1927_v19, %v1927_v19  ;;  %v3240_v19 = vld [vmem:[%s3610_s22] sm:$0xff]  }
 0x49c   : > { %v1930_v20 = vpack.c.bf16 %v1926_v18, %v1926_v18 }
 0x49e   : > { %3089 = vmatmul.mubr.msk.bf16.vlgmr.msra.gmra.mrb[36].mxu0 %vm1691_vm5, %v1930_v20  ;;  %v3241_v20 = vld [vmem:[%s3610_s22 + $0x8] sm:$0xff]  }
 0x49f   : > { %3099 = vmatpush3.bf16.msra.mxu0 %v2133_v21  ;;  %3100 = vmatprep.mubr.msk.bf16.mxu0 %vm3364_vm4, %v3363_v17  ;;  %v3243_v21 = vld [vmem:[%s3624_s12 + $0x8] sm:$0xff]  }
 0x4a0   : > { %3110 = vmatprep.subr.bf16.mxu0 %v3363_v17 }
 0x4a1   : > { %3095 = vmatmul.mubr.msk.bf16.vlgmr.msra.gmra.mrb[36].mxu1 %vm1691_vm5, %v1931_v22 }
 0x4a2   : > { %3106 = vmatprep.mubr.msk.bf16.mxu1 %vm3364_vm4, %v3363_v17  ;;  %3105 = vmatpush3.bf16.msra.mxu1 %v2179_v24 }
 0x4a3   : > { %3116 = vmatprep.subr.bf16.mxu1 %v3363_v17 }
 0x568   : > { %v1977_v26 = vpop.f32.mrb[32].mxu0 }
 0x569   : > { %v2121_v27 = vpack.c.bf16 %v1977_v26, %v1977_v26  ;;  %v3078_v28 = vpop.f32.mrb[33].mxu0  ;;  %v2864_v26 = vld [vmem:[%s4051_s2] ss:$0 sm:$0xff] }
 0x56a   : > { %v1980_v30 = vpop.f32.mrb[34].mxu0  ;;  %v2865_v28 = vld [vmem:[%s849_s24] ss:$0 sm:$0xff]  ;;  %s4054_s24 = sld [smem:[#allocation7_spill]] }
 0x56b   : > { %v3079_v32 = vpop.f32.mrb[35].mxu0  ;;  %3101 = vmatmul.mubr.msk.bf16.vlgmr.msra.gmra.mrb[40].mxu0 %vm1691_vm5, %v2121_v27 }
 0x56c   : > { %v2023_v33 = vpop.f32.mrb[32].mxu1  ;;  %3111 = vmatpush3.bf16.msra.mxu0 %v2225_v29  ;;  %3112 = vmatprep.mubr.msk.bf16.mxu0 %vm3364_vm4, %v3363_v17  ;;  %v3244_v32 = vld [vmem:[%s3624_s12 + $0x10] sm:$0xff]  }
 0x56d   : > { %v2122_v34 = vpack.c.bf16 %v2023_v33, %v2023_v33  ;;  %v3084_v35 = vpop.f32.mrb[33].mxu1  ;;  %3122 = vmatprep.subr.bf16.mxu0 %v3363_v17  ;;  %v3245_v33 = vld [vmem:[%s3624_s12 + $0x18] sm:$0xff]  }
 0x56e   : > { %v2026_v37 = vpop.f32.mrb[34].mxu1 }
 0x56f   : > { %v3085_v38 = vpop.f32.mrb[35].mxu1  ;;  %3107 = vmatmul.mubr.msk.bf16.vlgmr.msra.gmra.mrb[40].mxu1 %vm1691_vm5, %v2122_v34  ;;  %v2866_v34 = vld [vmem:[%s857_s30] ss:$0 sm:$0xff]  ;;  %s2527_s30 = sshll.u32 %s3626_s29, 4  ;;  %s3896_s30 = int_to_ptr.vmem [resolvable:$true] %s2527_s30 }
 0x570   : > { %3117 = vmatpush3.bf16.msra.mxu1 %v2271_v36  ;;  %3118 = vmatprep.mubr.msk.bf16.mxu1 %vm3364_vm4, %v3363_v17  ;;  %s4058_s23 = sand.u32 1, %s4054_s24   ;;  %s3266_s5 = scalar_lea.vmem %s3896_s30, 128 }
 0x571   : > { %v2069_v39 = vpop.f32.mrb[36].mxu0  ;;  %3130 = vmatprep.subr.bf16.mxu1 %v3363_v17  ;;  %p3267_p1 = scmp.ne.s32.totalorder %s3896_s30, %s3266_s5  ;;  %p3273_p5 = scmp.lt.s32.totalorder %s3896_s30, %s3271_s6 }
 0x572   : > { %v2123_v40 = vpack.c.bf16 %v2069_v39, %v2069_v39  ;;  %v3090_v41 = vpop.f32.mrb[37].mxu0  ;;  %p3274_p6 = scmp.lt.s32.totalorder %s3272_s0, %s3266_s5 }
 0x573   : > { %v2072_v42 = vpop.f32.mrb[38].mxu0  ;;  %p3268_p2 = pnand %p3267_p1, %p3510_p3 }
 0x574   : > { %v3091_v43 = vpop.f32.mrb[39].mxu0  ;;  %3113 = vmatmul.mubr.msk.bf16.vlgmr.msra.gmra.mrb[44].mxu0 %vm1691_vm5, %v2123_v40  ;;  %v2115_v44 = vpop.f32.mrb[36].mxu1  ;;  %v2875_v42 = vld [vmem:[%s865_s21] ss:$0 sm:$0xff]  ;;  %s2514_s21 = scalar_lea.sflag [#allocation4], %s4058_s23  ;;  %p3275_p7 = por %p3274_p6, %p3273_p5 }
 0x575   : > { %v2124_v45 = vpack.c.bf16 %v2115_v44, %v2115_v44  ;;  %v3096_v46 = vpop.f32.mrb[37].mxu1  ;;  %3126 = vmatprep.mubr.msk.bf16.mxu0 %vm3364_vm4, %v3363_v17  ;;  %3123 = vmatpush3.bf16.msra.mxu0 %v3240_v19  ;;  %p3269_p4 = pneg %p3268_p2 }
 0x576   : > { %v2118_v47 = vpop.f32.mrb[38].mxu1  ;;  %3124 = vmatprep.subr.bf16.mxu0 %v3363_v17 }
 0x577   : > { %v3097_v48 = vpop.f32.mrb[39].mxu1  ;;  %3119 = vmatmul.mubr.msk.bf16.vlgmr.msra.gmra.mrb[44].mxu1 %vm1691_vm5, %v2124_v45  ;;  %p3276_p8 = pnand %p3275_p7, %p3269_p4 }
 0x578   : > { %3138 = vmatprep.mubr.msk.bf16.mxu1 %vm3364_vm4, %v3363_v17 }
 0x579   : > { %3125 = vmatpush3.bf16.msra.mxu0 %v3241_v20 }
 0x63e   : > { %v2169_v49 = vpop.f32.mrb[40].mxu0 }
 0x63f   : > { %v3102_v50 = vpop.f32.mrb[41].mxu0  ;;  %v2313_v54 = vsel %vm892_vm3, %v2169_v49, 0.0 }
 0x640   : > { %v2172_v51 = vpop.f32.mrb[42].mxu0 }
 0x641   : > { %v3103_v52 = vpop.f32.mrb[43].mxu0 }
 0x642   : > { %v2215_v53 = vpop.f32.mrb[40].mxu1 }
 0x643   : > { %v2314_v55 = vsel %vm892_vm3, %v2215_v53, 0.0  ;;  %v3108_v56 = vpop.f32.mrb[41].mxu1 }
 0x644   : > { %v2315_v57 = vadd.f32 %v2314_v55, %v2313_v54  ;;  %v2218_v58 = vpop.f32.mrb[42].mxu1 }
 0x645   : > { %v3109_v59 = vpop.f32.mrb[43].mxu1 }
 0x647   : > { %v2261_v60 = vpop.f32.mrb[44].mxu0 }
 0x648   : > { %v2316_v61 = vsel %vm892_vm3, %v2261_v60, 0.0  ;;  %v3114_v62 = vpop.f32.mrb[45].mxu0 }
 0x649   : > { %v2317_v63 = vadd.f32 %v2316_v61, %v2315_v57  ;;  %v2264_v2 = vpop.f32.mrb[46].mxu0 }
 0x64a   : > { %v3115_v3 = vpop.f32.mrb[47].mxu0  ;;  %v2307_v4 = vpop.f32.mrb[44].mxu1 }
 0x64b   : > { %v2318_v5 = vsel %vm892_vm3, %v2307_v4, 0.0  ;;  %v3120_v6 = vpop.f32.mrb[45].mxu1 }
 0x64c   : > { %v2319_v7 = vadd.f32 %v2318_v5, %v2317_v63  ;;  %v2310_v9 = vpop.f32.mrb[46].mxu1 }
 0x64d   : > { %v3121_v10 = vpop.f32.mrb[47].mxu1 }
 0x64e   : > { %v2320_v12 = vadd.f32 %v2319_v7, %v3636_v8  ;;  %v3242_v8 = vld [vmem:[%s3624_s12] sm:$0xff]  }
 0x64f   : > { %3131 = vmatpush3.bf16.msra.mxu1 %v3242_v8 }
 0x650   : > { %v2328_v13 = vadd.f32 %v2863_v11, %v2320_v12  ;;  %3132 = vmatprep.subr.bf16.mxu1 %v3363_v17 }
 0x652   : > { %v2329_v0 = vsel %vm892_vm3, %v2328_v13, 0.0 }
 0x653   : > { %2330 = vadd.xlane.f32.xlu0 %v2329_v0  ;;  %3133 = vmatpush3.bf16.msra.mxu1 %v3243_v21 }
 0x654   : > { %3134 = vmatprep.subr.bf16.mxu1 %v3363_v17 }
 0x657   : > { %3135 = vmatpush3.bf16.msra.mxu1 %v3244_v32 }
 0x658   : > { %3136 = vmatprep.subr.bf16.mxu1 %v3363_v17 }
 0x65b   : > { %3137 = vmatpush3.bf16.msra.mxu1 %v3245_v33 }
 0x6e0   : > { %v2331_v14 = vpop.xlane.xlu0 %2330 }
 0x6e1   : > { %v2332_v15 = vmul.f32 0.03125, %v2331_v14 }
 0x6e3   : > { %v2333_v1 = vsub.f32 %v2328_v13, %v2332_v15 }
 0x6e5   : > { %v2334_v16 = vmul.f32 %v2333_v1, %v2333_v1 }
 0x6e7   : > { %v2335_v18 = vsel %vm892_vm3, %v2334_v16, 0.0 }
 0x6e8   : > { %2336 = vadd.xlane.f32.xlu1 %v2335_v18 }
 0x775   : > { %v2337_v22 = vpop.xlane.xlu1 %2336 }
 0x776   : > { %v2338_v23 = vmul.f32 0.03125, %v2337_v22 }
 0x778   : > { %v2339_v24 = vadd.f32 1e-05, %v2338_v23 }
 0x77a   : > { %3264 = vrsqrt.f32 %v2339_v24 }
 0x784   : > { %v3265_v25 = vpop.eup %3264 }
 0x785   : > { %v2341_v27 = vmul.f32 %v3265_v25, %v2333_v1 }
 0x787   : > { %v2349_v29 = vmul.f32 %v2864_v26, %v2341_v27 }
 0x789   : > { %v2357_v30 = vadd.f32 %v2865_v28, %v2349_v29 }
 0x78b   : > { %v2358_v31 = vpack.c.bf16 %v2357_v30, %v2357_v30 }
 0x78d   : > { %3127 = vmatmul.mubr.msk.bf16.vlgmr.msra.gmra.mrb[48].mxu0 %vm892_vm3, %v2358_v31 }
 0x860   : > { %v2419_v35 = vpop.f32.mrb[48].mxu0 }
 0x861   : > { %v2420_v36 = vadd.f32 %v2866_v34, %v2419_v35  ;;  %v3128_v37 = vpop.f32.mrb[49].mxu0 }
 0x862   : > { %v2422_v38 = vpop.f32.mrb[50].mxu0 }
 0x863   : > { %v2425_v39 = vmax.f32 %v2420_v36, 0.0  ;;  %v3129_v40 = vpop.f32.mrb[51].mxu0 }
 0x865   : > { %v2426_v41 = vpack.c.bf16 %v2425_v39, %v2425_v39 }
 0x867   : > { %3139 = vmatmul.mubr.msk.bf16.vlgmr.msra.gmra.mrb[48].mxu1 %vm2459_vm7, %v2426_v41 }
 0x93a   : > { %v2497_v17 = vpop.f32.mrb[48].mxu1 }
 0x93b   : > { %v2503_v43 = vadd.f32 %v2497_v17, %v2328_v13  ;;  %v3140_v44 = vpop.f32.mrb[49].mxu1 }
 0x93c   : > { %v2500_v45 = vpop.f32.mrb[50].mxu1 }
 0x93d   : > { %v2511_v46 = vadd.f32 %v2875_v42, %v2503_v43  ;;  %v3141_v47 = vpop.f32.mrb[51].mxu1 }
 0x93f   : > { %2512 = vst.msk [vmem:[%s3626_s29] sm:$0xff] %vm892_vm3, %v2511_v46 }
 0x940   : > { %3279 = shalt.err (!%p3276_p8)
}
 0x941   : > { %s3280_s29 = scalar_lea.hbm %s3894_s4, 128  ;;  %s3284_s17 = scalar_lea.hbm %s4057_s25, 256 }
 0x942   : > { %p3281_p10 = scmp.ne.s32.totalorder %s3894_s4, %s3280_s29  ;;  %p3285_p13 = scmp.lt.u32.totalorder %s3894_s4, %s4057_s25 }
 0x943   : > { %p3286_p0 = scmp.lt.u32.totalorder %s3284_s17, %s3280_s29  ;;  %p3288_p2 = scmp.lt.u32.totalorder %s3280_s29, %s3894_s4 }
 0x944   : > { %p3282_p11 = pnand %p3281_p10, %p3510_p3 }
 0x945   : > { %p3287_p1 = por %p3286_p0, %p3285_p13 }
 0x946   : > { %p3283_p12 = pneg %p3282_p11 }
 0x947   : > { %p3289_p4 = por %p3288_p2, %p3287_p1 }
 0x949   : > { %p3290_p5 = pnand %p3289_p4, %p3283_p12 }
 0x94b   : > { %3293 = shalt.err (!%p3290_p5)
}
 0x94c   : > { %3142 = dma.vmem_to_hbm [thread:$0]  (%p3510_p3), %s3896_s30, 128, %s3894_s4, %s2514_s21  }
 0x94d PF: > { %s4059_s8 = sld [smem:[#allocation13_spill]]  ;;  %s4060_s1 = sld [smem:[#allocation6_spill]] }
 0x953   : > { %p3148_p6 = scmp.ge.s32.totalorder %s4059_s8, 2  ;;  %s2539_s7 = sand.u32 1, %s4060_s1  }
 0x954   : > { %s2540_s9 = scalar_lea.sflag [#allocation4], %s2539_s7 }
 0x955   : > { %p3145_p7 = pnand %p3148_p6, %p3520_p9 }
 0x957   : > { %3327 = dma.done.wait (!%p3145_p7), %s2540_s9, 128  }
 0x958   : > { %3329 = vsyncadd (!%p3145_p7), %s2540_s9, 4294967168  ;;  %s31_s20 = sadd.s32 1, %s4059_s8   ;;  %s4062_s27 = sld [smem:[#allocation7_spill]] }
 0x959   : > { %p28_p8 = scmp.ge.s32.totalorder %s31_s20, 6   ;;  %s4063_s28 = sld [smem:[#allocation8_spill]] }
 0x95a   : > { %s4064_s29 = sld [smem:[#allocation18_spill]]  ;;  %s4065_s30 = sld [smem:[#allocation11_spill]] }
 0x95b   : > { %s4066_s0 = sld [smem:[#allocation12_spill]]  ;;  %s4067_s19 = sld [smem:[#allocation14_spill]] }
 0x95c   : > { %s4068_s1 = sld [smem:[#allocation16_spill]]  ;;  %30 = sbr.rel (!%p28_p8) target bundleno = 22 (0x16), region = 182 }
 0x963   :  { %2545 = vsyncpa [#allocation4], 1 }
 0x964   :  { %2547 = vsyncpa [#allocation4 + $0x1], 1 }

</bundles_post_ra>
